<compile_context>
chip_gen: v6e
topology: v6e:2x2x1
jax: 0.10.0
libtpu: 0.0.40
codegen_flags: <defaults>
</compile_context>

<pallas_src>
import functools
import math

import jax
import jax.numpy as jnp
from jax.experimental import pallas as pl
from jax.experimental.pallas import tpu as pltpu

_LN_EPS = 1e-5  # PyTorch nn.LayerNorm default


def _round_up(x, m):
    return ((x + m - 1) // m) * m


def _vt_kernel(d_true, approx_recip,
               text_ref, video_ref,
               ln1w_ref, ln1b_ref, ln2w_ref, ln2b_ref, ln3w_ref, ln3b_ref,
               wq_ref, bq_ref, wkv_ref, bkv_ref, wo_ref, bo_ref, wl_ref, bl_ref,
               out_ref):
    """One batch tile of the full forward pass (weights VMEM-resident across the grid)."""
    TB, D = text_ref.shape            # D == padded embed dim (lane-dense)
    F = video_ref.shape[0]
    inv_d = jnp.float32(1.0 / d_true)
    need_mask = (d_true != D)
    if need_mask:
        # 1.0 on true feature lanes, 0.0 on padded lanes (2-D iota along lanes).
        lane_mask = (jax.lax.broadcasted_iota(jnp.int32, (1, D), 1) < d_true
                     ).astype(jnp.float32)

    def layer_norm(x, w, b):
        # Two-pass LayerNorm in f32 (robust to non-zero-centered inputs).
        # Padded lanes are masked out of the variance; they are re-zeroed in the
        # output because w = b = 0 there, so numerics match LN over the true dim.
        mu = jnp.sum(x, axis=-1, keepdims=True) * inv_d
        xc = x - mu
        if need_mask:
            xc = xc * lane_mask
        var = jnp.sum(xc * xc, axis=-1, keepdims=True) * inv_d
        return xc * jax.lax.rsqrt(var + _LN_EPS) * w + b

    mm_dtype = wq_ref.dtype
    ln1w = ln1w_ref[...]
    ln1b = ln1b_ref[...]

    # layer_norm1 shared by text and video (matches the module)
    t_ln = layer_norm(text_ref[...].astype(jnp.float32), ln1w, ln1b)      # [TB, D]
    v_ln = layer_norm(video_ref[...].astype(jnp.float32), ln1w, ln1b)     # [F, TB, D]
    v_ln = v_ln.reshape(F * TB, D)     # free merge: TB is a multiple of 8

    # Projections on the MXU (bf16 operands by default, f32 accumulation).
    # The 1/sqrt(embed_dim) attention scale is folded into wq/bq wrapper-side.
    q = jnp.dot(t_ln.astype(mm_dtype), wq_ref[...],
                preferred_element_type=jnp.float32) + bq_ref[...]          # [TB, D]
    kv = jnp.dot(v_ln.astype(mm_dtype), wkv_ref[...],
                 preferred_element_type=jnp.float32) + bkv_ref[...]        # [F*TB, 2D]

    # Cross-attention with a single query per batch row (M = 1): keep it off the
    # MXU.  Accumulate per frame so temporaries stay at [TB, D] (no [TB, F, D]
    # broadcast blob when TB is large).  Per-frame slices of kv are contiguous.
    logit_cols = []
    for f in range(F):
        k_f = kv[f * TB:(f + 1) * TB, :D]
        logit_cols.append(jnp.sum(q * k_f, axis=-1, keepdims=True))        # [TB, 1]
    m = logit_cols[0]
    for c in logit_cols[1:]:
        m = jnp.maximum(m, c)
    e_cols = [jnp.exp(c - m) for c in logit_cols]
    denom = e_cols[0]
    for c in e_cols[1:]:
        denom = denom + c
    if approx_recip:
        inv_denom = pl.reciprocal(denom, approx=True)                      # EUP slot
    else:
        inv_denom = 1.0 / denom
    attn = (e_cols[0] * inv_denom) * kv[0:TB, D:]
    for f in range(1, F):
        attn = attn + (e_cols[f] * inv_denom) * kv[f * TB:(f + 1) * TB, D:]

    # out_proj + LN2
    attn = jnp.dot(attn.astype(mm_dtype), wo_ref[...],
                   preferred_element_type=jnp.float32) + bo_ref[...]
    attn_out = layer_norm(attn, ln2w_ref[...], ln2b_ref[...])

    # linear_proj + residual (dropout == identity at inference) + LN3
    lin = jnp.dot(attn_out.astype(mm_dtype), wl_ref[...],
                  preferred_element_type=jnp.float32) + bl_ref[...]
    out_ref[...] = layer_norm(attn_out + lin, ln3w_ref[...], ln3b_ref[...])


def _vmem_ceiling_bytes():
    """Generation-aware usable-VMEM ceiling (v7x 64 MiB/TC vs v5e/v6e 128 MiB)."""
    try:
        cap = int(pltpu.get_tpu_info().vmem_capacity_bytes)
    except Exception:
        cap = 64 << 20        # conservative fallback (v7x per-TensorCore)
    return max(32 << 20, min(cap, 128 << 20) - (8 << 20))


def video_transformer_forward(text_embeds, video_embeds, params, *,
                              batch_tile=None,
                              matmul_dtype=jnp.bfloat16,
                              activation_dtype=jnp.bfloat16,
                              approx_softmax=None):
    """Pallas wrapper.  text_embeds: [B, D], video_embeds: [B, F, D] -> [B, D] f32.

    Weight convention: params['w*'] are PRE-TRANSPOSED as [in, out] so the kernel
    computes y = x @ W + b (== PyTorch y = x @ W.T + b); biases / LN params are
    [1, D] rows.
    """
    B, D = text_embeds.shape
    Bv, F, Dv = video_embeds.shape
    assert Bv == B and Dv == D

    f32 = jnp.float32
    mm_dt = jnp.dtype(matmul_dtype)
    act_dt = jnp.dtype(activation_dtype)
    if approx_softmax is None:
        approx_softmax = (mm_dt == jnp.dtype(jnp.bfloat16))

    D_pad = _round_up(D, 128)          # lane-dense: unmasked 128-wide stores

    def pad2(a, rows, cols, dtype):
        a = jnp.asarray(a)
        if a.shape == (rows, cols) and a.dtype == jnp.dtype(dtype):
            return a
        out = jnp.zeros((rows, cols), dtype)
        return out.at[:a.shape[0], :a.shape[1]].set(a.astype(dtype))

    scale = 1.0 / math.sqrt(D)         # fold attention scale into q projection
    wq = pad2(params['wq'] * scale, D_pad, D_pad, mm_dt)
    bq = pad2(params['bq'] * scale, 1, D_pad, f32)
    # Fused K/V projection: one [D, 2D] matmul instead of two [D, D].
    wkv = jnp.concatenate([pad2(params['wk'], D_pad, D_pad, mm_dt),
                           pad2(params['wv'], D_pad, D_pad, mm_dt)], axis=1)
    bkv = jnp.concatenate([pad2(params['bk'], 1, D_pad, f32),
                           pad2(params['bv'], 1, D_pad, f32)], axis=1)
    wo = pad2(params['wo'], D_pad, D_pad, mm_dt)
    bo = pad2(params['bo'], 1, D_pad, f32)
    wl = pad2(params['wl'], D_pad, D_pad, mm_dt)
    bl = pad2(params['bl'], 1, D_pad, f32)
    ln = [pad2(params[n], 1, D_pad, f32)
          for n in ('ln1_w', 'ln1_b', 'ln2_w', 'ln2_b', 'ln3_w', 'ln3_b')]
    weight_inputs = ln + [wq, bq, wkv, bkv, wo, bo, wl, bl]
    weight_bytes = sum(int(a.size) * a.dtype.itemsize for a in weight_inputs)

    vmem_ceiling = _vmem_ceiling_bytes()
    act_bytes = act_dt.itemsize
    w_itemsize = mm_dt.itemsize

    # Per-batch-row VMEM cost: double-buffered DMA tiles + in-kernel f32 temporaries
    # (v_ln, its bf16 cast, kv, and a handful of [TB, D] values).
    dma_per_row = D_pad * (act_bytes * (1 + F) + 4)
    temp_per_row = D_pad * (F * (12 + w_itemsize) + 40)

    if batch_tile is None:
        budget = vmem_ceiling - weight_bytes - (4 << 20)
        tb = budget // (2 * dma_per_row + temp_per_row)
        tb = max(8, min(256, (tb // 8) * 8))
        tb = min(tb, _round_up(B, 8))
        # v7x has 2 TensorCores: keep the "parallel" batch axis at >= 2 grid steps.
        if B > 8 and _round_up(B, tb) // tb < 2:
            tb = max(8, _round_up((B + 1) // 2, 8))
        TB = tb
    else:
        assert batch_tile % 8 == 0
        TB = batch_tile
    B_pad = _round_up(max(B, TB), TB)
    grid = (B_pad // TB,)

    # Activations: bf16 DMA (half the per-step HBM read) unless overridden.
    # Video is transposed to [F, B, D] so per-frame slices in the kernel are
    # contiguous; the transpose fuses with the cast/pad copy.  Padding copies are
    # skipped when the inputs are already aligned and in the DMA dtype.
    if text_embeds.shape == (B_pad, D_pad) and text_embeds.dtype == act_dt:
        text_p = text_embeds
    else:
        text_p = jnp.zeros((B_pad, D_pad), act_dt)
        text_p = text_p.at[:B, :D].set(text_embeds.astype(act_dt))
    video_t = jnp.swapaxes(video_embeds, 0, 1)                    # [F, B, D]
    if video_t.shape == (F, B_pad, D_pad) and video_t.dtype == act_dt:
        video_p = video_t
    else:
        video_p = jnp.zeros((F, B_pad, D_pad), act_dt)
        video_p = video_p.at[:, :B, :D].set(video_t.astype(act_dt))

    def resident_spec(a):
        # Full-array block, constant index_map, SINGLE buffer: fetched once and
        # kept VMEM-resident across the whole batch grid (no wasted second buffer).
        return pl.BlockSpec(a.shape, lambda i: (0, 0),
                            pipeline_mode=pl.Buffered(1))

    in_specs = (
        [pl.BlockSpec((TB, D_pad), lambda i: (i, 0)),
         pl.BlockSpec((F, TB, D_pad), lambda i: (0, i, 0))]
        + [resident_spec(a) for a in weight_inputs]
    )
    out_specs = pl.BlockSpec((TB, D_pad), lambda i: (i, 0))

    dma_tile_bytes = TB * dma_per_row
    temp_bytes = TB * temp_per_row
    vmem_limit = int(min(vmem_ceiling,
                         max(16 << 20,
                             weight_bytes + 2 * dma_tile_bytes + temp_bytes + (4 << 20))))

    out_p = pl.pallas_call(
        functools.partial(_vt_kernel, D, bool(approx_softmax)),
        out_shape=jax.ShapeDtypeStruct((B_pad, D_pad), f32),
        grid=grid,
        in_specs=in_specs,
        out_specs=out_specs,
        compiler_params=pltpu.CompilerParams(
            dimension_semantics=("parallel",),        # megacore-shardable batch axis
            vmem_limit_bytes=vmem_limit),
    )(text_p, video_p, *weight_inputs)

    return out_p[:B, :D]


def reference_forward(text_embeds, video_embeds, p):
    """Pure-JAX reference replicating the PyTorch forward (eval mode)."""
    def ln(x, w, b):
        mu = jnp.mean(x, axis=-1, keepdims=True)
        var = jnp.mean(jnp.square(x - mu), axis=-1, keepdims=True)
        return (x - mu) / jnp.sqrt(var + _LN_EPS) * w + b

    D = text_embeds.shape[-1]
    t = ln(text_embeds, p['ln1_w'], p['ln1_b'])
    vv = ln(video_embeds, p['ln1_w'], p['ln1_b'])
    q = t @ p['wq'] + p['bq']
    k = vv @ p['wk'] + p['bk']
    v = vv @ p['wv'] + p['bv']
    logits = jnp.einsum('bd,bfd->bf', q, k) / math.sqrt(D)
    w = jax.nn.softmax(logits, axis=-1)
    attn = jnp.einsum('bf,bfd->bd', w, v)
    attn = attn @ p['wo'] + p['bo']
    attn_out = ln(attn, p['ln2_w'], p['ln2_b'])
    lin = attn_out @ p['wl'] + p['bl']
    return ln(attn_out + lin, p['ln3_w'], p['ln3_b'])


def make_params(key, embed_dim):
    """Deterministic synthetic parameters (random instead of eye-init so the
    matmul path is actually exercised; shapes match the PyTorch module)."""
    ks = jax.random.split(key, 16)
    d = embed_dim

    def w(k):   # [in, out] == PyTorch weight.T
        return 0.1 * jax.random.normal(k, (d, d), jnp.float32)

    def b(k):
        return 0.1 * jax.random.normal(k, (1, d), jnp.float32)

    return {
        'wq': w(ks[0]), 'bq': b(ks[1]),
        'wk': w(ks[2]), 'bk': b(ks[3]),
        'wv': w(ks[4]), 'bv': b(ks[5]),
        'wo': w(ks[6]), 'bo': b(ks[7]),
        'wl': w(ks[8]), 'bl': b(ks[9]),
        'ln1_w': 1.0 + 0.1 * jax.random.normal(ks[10], (1, d), jnp.float32),
        'ln1_b': 0.1 * jax.random.normal(ks[11], (1, d), jnp.float32),
        'ln2_w': 1.0 + 0.1 * jax.random.normal(ks[12], (1, d), jnp.float32),
        'ln2_b': 0.1 * jax.random.normal(ks[13], (1, d), jnp.float32),
        'ln3_w': 1.0 + 0.1 * jax.random.normal(ks[14], (1, d), jnp.float32),
        'ln3_b': 0.1 * jax.random.normal(ks[15], (1, d), jnp.float32),
    }


if __name__ == "__main__":
    root = jax.random.PRNGKey(0)

    # --- Case 1: module-scale shapes (batch=2, frames=8, embed_dim=32) ----------
    B, F, D = 2, 8, 32
    k_text, k_video, k_params, k2_text, k2_video = jax.random.split(root, 5)
    text_embeds = jax.random.normal(k_text, (B, D), jnp.float32)
    video_embeds = jax.random.normal(k_video, (B, F, D), jnp.float32)
    params = make_params(k_params, D)
    ref = reference_forward(text_embeds, video_embeds, params)

    # Tight structural check: f32 end-to-end (exact softmax reciprocal).
    out_f32 = video_transformer_forward(text_embeds, video_embeds, params,
                                        matmul_dtype=jnp.float32,
                                        activation_dtype=jnp.float32,
                                        approx_softmax=False)
    out_f32 = jax.block_until_ready(out_f32)
    assert out_f32.shape == (B, D)
    assert jnp.allclose(out_f32, ref, atol=5e-4, rtol=5e-4), (
        f"f32 path: max abs err = {jnp.max(jnp.abs(out_f32 - ref))}")

    # Optimized path: bf16 MXU operands + bf16 activation DMA + approx softmax recip.
    out = video_transformer_forward(text_embeds, video_embeds, params)
    out = jax.block_until_ready(out)
    assert out.shape == (B, D)
    assert jnp.allclose(out, ref, atol=1e-1, rtol=1e-1), (
        f"bf16 path: max abs err = {jnp.max(jnp.abs(out - ref))}")

    # --- Case 2: ragged shapes (grid > 1, padded batch rows, F not a mult. of 8) --
    B2, F2 = 24, 5
    text2 = jax.random.normal(k2_text, (B2, D), jnp.float32)
    video2 = jax.random.normal(k2_video, (B2, F2, D), jnp.float32)
    ref2 = reference_forward(text2, video2, params)
    out2 = video_transformer_forward(text2, video2, params,
                                     matmul_dtype=jnp.float32,
                                     activation_dtype=jnp.float32,
                                     approx_softmax=False)
    out2 = jax.block_until_ready(out2)
    assert out2.shape == (B2, D)
    assert jnp.allclose(out2, ref2, atol=5e-4, rtol=5e-4), (
        f"ragged f32 path: max abs err = {jnp.max(jnp.abs(out2 - ref2))}")

    print("KERNEL_OK")
</pallas_src>

<mosaic_0001>
module attributes {stable_mosaic.version = 11 : i64} {
  func.func @_vt_kernel(%arg0: i32, %arg1: memref<8x128xf32, #tpu.memory_space<vmem>>, %arg2: memref<8x8x128xf32, #tpu.memory_space<vmem>>, %arg3: memref<1x128xf32, #tpu.memory_space<vmem>>, %arg4: memref<1x128xf32, #tpu.memory_space<vmem>>, %arg5: memref<1x128xf32, #tpu.memory_space<vmem>>, %arg6: memref<1x128xf32, #tpu.memory_space<vmem>>, %arg7: memref<1x128xf32, #tpu.memory_space<vmem>>, %arg8: memref<1x128xf32, #tpu.memory_space<vmem>>, %arg9: memref<128x128xf32, #tpu.memory_space<vmem>>, %arg10: memref<1x128xf32, #tpu.memory_space<vmem>>, %arg11: memref<128x256xf32, #tpu.memory_space<vmem>>, %arg12: memref<1x256xf32, #tpu.memory_space<vmem>>, %arg13: memref<128x128xf32, #tpu.memory_space<vmem>>, %arg14: memref<1x128xf32, #tpu.memory_space<vmem>>, %arg15: memref<128x128xf32, #tpu.memory_space<vmem>>, %arg16: memref<1x128xf32, #tpu.memory_space<vmem>>, %arg17: memref<8x128xf32, #tpu.memory_space<vmem>>) attributes {dimension_semantics = [#tpu.dimension_semantics<parallel>], iteration_bounds = array<i64: 1>, scalar_prefetch = 0 : i64, scratch_operands = 0 : i64, tpu.core_type = #tpu.core_type<tc>, window_params = [{transform_indices = @transform_0, window_bounds = array<i64: 8, 128>}, {transform_indices = @transform_1, window_bounds = array<i64: 8, 8, 128>}, {pipeline_mode = #tpu.pipeline_mode<synchronous>, transform_indices = @transform_2, window_bounds = array<i64: 1, 128>}, {pipeline_mode = #tpu.pipeline_mode<synchronous>, transform_indices = @transform_3, window_bounds = array<i64: 1, 128>}, {pipeline_mode = #tpu.pipeline_mode<synchronous>, transform_indices = @transform_4, window_bounds = array<i64: 1, 128>}, {pipeline_mode = #tpu.pipeline_mode<synchronous>, transform_indices = @transform_5, window_bounds = array<i64: 1, 128>}, {pipeline_mode = #tpu.pipeline_mode<synchronous>, transform_indices = @transform_6, window_bounds = array<i64: 1, 128>}, {pipeline_mode = #tpu.pipeline_mode<synchronous>, transform_indices = @transform_7, window_bounds = array<i64: 1, 128>}, {pipeline_mode = #tpu.pipeline_mode<synchronous>, transform_indices = @transform_8, window_bounds = array<i64: 128, 128>}, {pipeline_mode = #tpu.pipeline_mode<synchronous>, transform_indices = @transform_9, window_bounds = array<i64: 1, 128>}, {pipeline_mode = #tpu.pipeline_mode<synchronous>, transform_indices = @transform_10, window_bounds = array<i64: 128, 256>}, {pipeline_mode = #tpu.pipeline_mode<synchronous>, transform_indices = @transform_11, window_bounds = array<i64: 1, 256>}, {pipeline_mode = #tpu.pipeline_mode<synchronous>, transform_indices = @transform_12, window_bounds = array<i64: 128, 128>}, {pipeline_mode = #tpu.pipeline_mode<synchronous>, transform_indices = @transform_13, window_bounds = array<i64: 1, 128>}, {pipeline_mode = #tpu.pipeline_mode<synchronous>, transform_indices = @transform_14, window_bounds = array<i64: 128, 128>}, {pipeline_mode = #tpu.pipeline_mode<synchronous>, transform_indices = @transform_15, window_bounds = array<i64: 1, 128>}, {transform_indices = @transform_16, window_bounds = array<i64: 8, 128>}]} {
    %0 = tpu.iota {dimensions = array<i32: 1>} : vector<1x128xi32>
    %c32_i32 = arith.constant 32 : i32
    %1 = vector.broadcast %c32_i32 : i32 to vector<1x128xi32>
    %2 = arith.cmpi slt, %0, %1 : vector<1x128xi32>
    %3 = arith.extui %2 : vector<1x128xi1> to vector<1x128xi32>
    %4 = arith.sitofp %3 : vector<1x128xi32> to vector<1x128xf32>
    %c0 = arith.constant 0 : index
    %c0_0 = arith.constant 0 : index
    %5 = vector.load %arg3[%c0, %c0_0] : memref<1x128xf32, #tpu.memory_space<vmem>>, vector<1x128xf32>
    %c0_1 = arith.constant 0 : index
    %c0_2 = arith.constant 0 : index
    %6 = vector.load %arg4[%c0_1, %c0_2] : memref<1x128xf32, #tpu.memory_space<vmem>>, vector<1x128xf32>
    %c0_3 = arith.constant 0 : index
    %c0_4 = arith.constant 0 : index
    %7 = vector.load %arg1[%c0_3, %c0_4] : memref<8x128xf32, #tpu.memory_space<vmem>>, vector<8x128xf32>
    %cst = arith.constant dense<0.000000e+00> : vector<8xf32>
    %8 = vector.multi_reduction <add>, %7, %cst [1] : vector<8x128xf32> to vector<8xf32>
    %9 = vector.shape_cast %8 : vector<8xf32> to vector<8x1xf32>
    %cst_5 = arith.constant 3.125000e-02 : f32
    %10 = vector.broadcast %cst_5 : f32 to vector<8x1xf32>
    %11 = arith.mulf %9, %10 : vector<8x1xf32>
    %12 = vector.broadcast %11 : vector<8x1xf32> to vector<8x128xf32>
    %13 = arith.subf %7, %12 : vector<8x128xf32>
    %14 = vector.broadcast %4 : vector<1x128xf32> to vector<8x128xf32>
    %15 = arith.mulf %13, %14 : vector<8x128xf32>
    %16 = arith.mulf %15, %15 : vector<8x128xf32>
    %cst_6 = arith.constant dense<0.000000e+00> : vector<8xf32>
    %17 = vector.multi_reduction <add>, %16, %cst_6 [1] : vector<8x128xf32> to vector<8xf32>
    %18 = vector.shape_cast %17 : vector<8xf32> to vector<8x1xf32>
    %cst_7 = arith.constant 3.125000e-02 : f32
    %19 = vector.broadcast %cst_7 : f32 to vector<8x1xf32>
    %20 = arith.mulf %18, %19 : vector<8x1xf32>
    %cst_8 = arith.constant 9.99999974E-6 : f32
    %21 = vector.broadcast %cst_8 : f32 to vector<8x1xf32>
    %22 = arith.addf %20, %21 : vector<8x1xf32>
    %23 = math.rsqrt %22 : vector<8x1xf32>
    %24 = vector.broadcast %23 : vector<8x1xf32> to vector<8x128xf32>
    %25 = arith.mulf %15, %24 : vector<8x128xf32>
    %26 = vector.broadcast %5 : vector<1x128xf32> to vector<8x128xf32>
    %27 = arith.mulf %25, %26 : vector<8x128xf32>
    %28 = vector.broadcast %6 : vector<1x128xf32> to vector<8x128xf32>
    %29 = arith.addf %27, %28 : vector<8x128xf32>
    %c0_9 = arith.constant 0 : index
    %c0_10 = arith.constant 0 : index
    %c0_11 = arith.constant 0 : index
    %30 = vector.load %arg2[%c0_9, %c0_10, %c0_11] : memref<8x8x128xf32, #tpu.memory_space<vmem>>, vector<8x8x128xf32>
    %cst_12 = arith.constant dense<0.000000e+00> : vector<8x8xf32>
    %31 = vector.multi_reduction <add>, %30, %cst_12 [2] : vector<8x8x128xf32> to vector<8x8xf32>
    %32 = vector.shape_cast %31 : vector<8x8xf32> to vector<8x8x1xf32>
    %cst_13 = arith.constant 3.125000e-02 : f32
    %33 = vector.broadcast %cst_13 : f32 to vector<8x8x1xf32>
    %34 = arith.mulf %32, %33 : vector<8x8x1xf32>
    %35 = vector.broadcast %34 : vector<8x8x1xf32> to vector<8x8x128xf32>
    %36 = arith.subf %30, %35 : vector<8x8x128xf32>
    %37 = vector.shape_cast %4 : vector<1x128xf32> to vector<1x1x128xf32>
    %38 = vector.broadcast %37 : vector<1x1x128xf32> to vector<8x8x128xf32>
    %39 = arith.mulf %36, %38 : vector<8x8x128xf32>
    %40 = arith.mulf %39, %39 : vector<8x8x128xf32>
    %cst_14 = arith.constant dense<0.000000e+00> : vector<8x8xf32>
    %41 = vector.multi_reduction <add>, %40, %cst_14 [2] : vector<8x8x128xf32> to vector<8x8xf32>
    %42 = vector.shape_cast %41 : vector<8x8xf32> to vector<8x8x1xf32>
    %cst_15 = arith.constant 3.125000e-02 : f32
    %43 = vector.broadcast %cst_15 : f32 to vector<8x8x1xf32>
    %44 = arith.mulf %42, %43 : vector<8x8x1xf32>
    %cst_16 = arith.constant 9.99999974E-6 : f32
    %45 = vector.broadcast %cst_16 : f32 to vector<8x8x1xf32>
    %46 = arith.addf %44, %45 : vector<8x8x1xf32>
    %47 = math.rsqrt %46 : vector<8x8x1xf32>
    %48 = vector.broadcast %47 : vector<8x8x1xf32> to vector<8x8x128xf32>
    %49 = arith.mulf %39, %48 : vector<8x8x128xf32>
    %50 = vector.shape_cast %5 : vector<1x128xf32> to vector<1x1x128xf32>
    %51 = vector.broadcast %50 : vector<1x1x128xf32> to vector<8x8x128xf32>
    %52 = arith.mulf %49, %51 : vector<8x8x128xf32>
    %53 = vector.shape_cast %6 : vector<1x128xf32> to vector<1x1x128xf32>
    %54 = vector.broadcast %53 : vector<1x1x128xf32> to vector<8x8x128xf32>
    %55 = arith.addf %52, %54 : vector<8x8x128xf32>
    %56 = vector.shape_cast %55 : vector<8x8x128xf32> to vector<64x128xf32>
    %c0_17 = arith.constant 0 : index
    %c0_18 = arith.constant 0 : index
    %57 = vector.load %arg9[%c0_17, %c0_18] : memref<128x128xf32, #tpu.memory_space<vmem>>, vector<128x128xf32>
    %cst_19 = arith.constant dense<0.000000e+00> : vector<8x128xf32>
    %58 = tpu.matmul %29, %57, %cst_19 {dimension_numbers = #tpu.dot_dimension_numbers<[1], [0], [0], [1], [0, 0, 1, 1], [], []>} : vector<8x128xf32>, vector<128x128xf32>, vector<8x128xf32> -> vector<8x128xf32>
    %c0_20 = arith.constant 0 : index
    %c0_21 = arith.constant 0 : index
    %59 = vector.load %arg10[%c0_20, %c0_21] : memref<1x128xf32, #tpu.memory_space<vmem>>, vector<1x128xf32>
    %60 = vector.broadcast %59 : vector<1x128xf32> to vector<8x128xf32>
    %61 = arith.addf %58, %60 : vector<8x128xf32>
    %c0_22 = arith.constant 0 : index
    %c0_23 = arith.constant 0 : index
    %62 = vector.load %arg11[%c0_22, %c0_23] : memref<128x256xf32, #tpu.memory_space<vmem>>, vector<128x256xf32>
    %cst_24 = arith.constant dense<0.000000e+00> : vector<64x256xf32>
    %63 = tpu.matmul %56, %62, %cst_24 {dimension_numbers = #tpu.dot_dimension_numbers<[1], [0], [0], [1], [0, 0, 1, 1], [], []>} : vector<64x128xf32>, vector<128x256xf32>, vector<64x256xf32> -> vector<64x256xf32>
    %c0_25 = arith.constant 0 : index
    %c0_26 = arith.constant 0 : index
    %64 = vector.load %arg12[%c0_25, %c0_26] : memref<1x256xf32, #tpu.memory_space<vmem>>, vector<1x256xf32>
    %65 = vector.broadcast %64 : vector<1x256xf32> to vector<64x256xf32>
    %66 = arith.addf %63, %65 : vector<64x256xf32>
    %67 = vector.extract_strided_slice %66 {offsets = [0, 0], sizes = [8, 128], strides = [1, 1]} : vector<64x256xf32> to vector<8x128xf32>
    %68 = arith.mulf %61, %67 : vector<8x128xf32>
    %cst_27 = arith.constant dense<0.000000e+00> : vector<8xf32>
    %69 = vector.multi_reduction <add>, %68, %cst_27 [1] : vector<8x128xf32> to vector<8xf32>
    %70 = vector.shape_cast %69 : vector<8xf32> to vector<8x1xf32>
    %71 = vector.extract_strided_slice %66 {offsets = [8, 0], sizes = [8, 128], strides = [1, 1]} : vector<64x256xf32> to vector<8x128xf32>
    %72 = arith.mulf %61, %71 : vector<8x128xf32>
    %cst_28 = arith.constant dense<0.000000e+00> : vector<8xf32>
    %73 = vector.multi_reduction <add>, %72, %cst_28 [1] : vector<8x128xf32> to vector<8xf32>
    %74 = vector.shape_cast %73 : vector<8xf32> to vector<8x1xf32>
    %75 = vector.extract_strided_slice %66 {offsets = [16, 0], sizes = [8, 128], strides = [1, 1]} : vector<64x256xf32> to vector<8x128xf32>
    %76 = arith.mulf %61, %75 : vector<8x128xf32>
    %cst_29 = arith.constant dense<0.000000e+00> : vector<8xf32>
    %77 = vector.multi_reduction <add>, %76, %cst_29 [1] : vector<8x128xf32> to vector<8xf32>
    %78 = vector.shape_cast %77 : vector<8xf32> to vector<8x1xf32>
    %79 = vector.extract_strided_slice %66 {offsets = [24, 0], sizes = [8, 128], strides = [1, 1]} : vector<64x256xf32> to vector<8x128xf32>
    %80 = arith.mulf %61, %79 : vector<8x128xf32>
    %cst_30 = arith.constant dense<0.000000e+00> : vector<8xf32>
    %81 = vector.multi_reduction <add>, %80, %cst_30 [1] : vector<8x128xf32> to vector<8xf32>
    %82 = vector.shape_cast %81 : vector<8xf32> to vector<8x1xf32>
    %83 = vector.extract_strided_slice %66 {offsets = [32, 0], sizes = [8, 128], strides = [1, 1]} : vector<64x256xf32> to vector<8x128xf32>
    %84 = arith.mulf %61, %83 : vector<8x128xf32>
    %cst_31 = arith.constant dense<0.000000e+00> : vector<8xf32>
    %85 = vector.multi_reduction <add>, %84, %cst_31 [1] : vector<8x128xf32> to vector<8xf32>
    %86 = vector.shape_cast %85 : vector<8xf32> to vector<8x1xf32>
    %87 = vector.extract_strided_slice %66 {offsets = [40, 0], sizes = [8, 128], strides = [1, 1]} : vector<64x256xf32> to vector<8x128xf32>
    %88 = arith.mulf %61, %87 : vector<8x128xf32>
    %cst_32 = arith.constant dense<0.000000e+00> : vector<8xf32>
    %89 = vector.multi_reduction <add>, %88, %cst_32 [1] : vector<8x128xf32> to vector<8xf32>
    %90 = vector.shape_cast %89 : vector<8xf32> to vector<8x1xf32>
    %91 = vector.extract_strided_slice %66 {offsets = [48, 0], sizes = [8, 128], strides = [1, 1]} : vector<64x256xf32> to vector<8x128xf32>
    %92 = arith.mulf %61, %91 : vector<8x128xf32>
    %cst_33 = arith.constant dense<0.000000e+00> : vector<8xf32>
    %93 = vector.multi_reduction <add>, %92, %cst_33 [1] : vector<8x128xf32> to vector<8xf32>
    %94 = vector.shape_cast %93 : vector<8xf32> to vector<8x1xf32>
    %95 = vector.extract_strided_slice %66 {offsets = [56, 0], sizes = [8, 128], strides = [1, 1]} : vector<64x256xf32> to vector<8x128xf32>
    %96 = arith.mulf %61, %95 : vector<8x128xf32>
    %cst_34 = arith.constant dense<0.000000e+00> : vector<8xf32>
    %97 = vector.multi_reduction <add>, %96, %cst_34 [1] : vector<8x128xf32> to vector<8xf32>
    %98 = vector.shape_cast %97 : vector<8xf32> to vector<8x1xf32>
    %99 = arith.maximumf %70, %74 : vector<8x1xf32>
    %100 = arith.maximumf %99, %78 : vector<8x1xf32>
    %101 = arith.maximumf %100, %82 : vector<8x1xf32>
    %102 = arith.maximumf %101, %86 : vector<8x1xf32>
    %103 = arith.maximumf %102, %90 : vector<8x1xf32>
    %104 = arith.maximumf %103, %94 : vector<8x1xf32>
    %105 = arith.maximumf %104, %98 : vector<8x1xf32>
    %106 = arith.subf %70, %105 : vector<8x1xf32>
    %107 = math.exp %106 : vector<8x1xf32>
    %108 = arith.subf %74, %105 : vector<8x1xf32>
    %109 = math.exp %108 : vector<8x1xf32>
    %110 = arith.subf %78, %105 : vector<8x1xf32>
    %111 = math.exp %110 : vector<8x1xf32>
    %112 = arith.subf %82, %105 : vector<8x1xf32>
    %113 = math.exp %112 : vector<8x1xf32>
    %114 = arith.subf %86, %105 : vector<8x1xf32>
    %115 = math.exp %114 : vector<8x1xf32>
    %116 = arith.subf %90, %105 : vector<8x1xf32>
    %117 = math.exp %116 : vector<8x1xf32>
    %118 = arith.subf %94, %105 : vector<8x1xf32>
    %119 = math.exp %118 : vector<8x1xf32>
    %120 = arith.subf %98, %105 : vector<8x1xf32>
    %121 = math.exp %120 : vector<8x1xf32>
    %122 = arith.addf %107, %109 : vector<8x1xf32>
    %123 = arith.addf %122, %111 : vector<8x1xf32>
    %124 = arith.addf %123, %113 : vector<8x1xf32>
    %125 = arith.addf %124, %115 : vector<8x1xf32>
    %126 = arith.addf %125, %117 : vector<8x1xf32>
    %127 = arith.addf %126, %119 : vector<8x1xf32>
    %128 = arith.addf %127, %121 : vector<8x1xf32>
    %cst_35 = arith.constant 1.000000e+00 : f32
    %129 = vector.broadcast %cst_35 : f32 to vector<8x1xf32>
    %130 = arith.divf %129, %128 : vector<8x1xf32>
    %131 = arith.mulf %107, %130 : vector<8x1xf32>
    %132 = vector.extract_strided_slice %66 {offsets = [0, 128], sizes = [8, 128], strides = [1, 1]} : vector<64x256xf32> to vector<8x128xf32>
    %133 = vector.broadcast %131 : vector<8x1xf32> to vector<8x128xf32>
    %134 = arith.mulf %133, %132 : vector<8x128xf32>
    %135 = arith.mulf %109, %130 : vector<8x1xf32>
    %136 = vector.extract_strided_slice %66 {offsets = [8, 128], sizes = [8, 128], strides = [1, 1]} : vector<64x256xf32> to vector<8x128xf32>
    %137 = vector.broadcast %135 : vector<8x1xf32> to vector<8x128xf32>
    %138 = arith.mulf %137, %136 : vector<8x128xf32>
    %139 = arith.addf %134, %138 : vector<8x128xf32>
    %140 = arith.mulf %111, %130 : vector<8x1xf32>
    %141 = vector.extract_strided_slice %66 {offsets = [16, 128], sizes = [8, 128], strides = [1, 1]} : vector<64x256xf32> to vector<8x128xf32>
    %142 = vector.broadcast %140 : vector<8x1xf32> to vector<8x128xf32>
    %143 = arith.mulf %142, %141 : vector<8x128xf32>
    %144 = arith.addf %139, %143 : vector<8x128xf32>
    %145 = arith.mulf %113, %130 : vector<8x1xf32>
    %146 = vector.extract_strided_slice %66 {offsets = [24, 128], sizes = [8, 128], strides = [1, 1]} : vector<64x256xf32> to vector<8x128xf32>
    %147 = vector.broadcast %145 : vector<8x1xf32> to vector<8x128xf32>
    %148 = arith.mulf %147, %146 : vector<8x128xf32>
    %149 = arith.addf %144, %148 : vector<8x128xf32>
    %150 = arith.mulf %115, %130 : vector<8x1xf32>
    %151 = vector.extract_strided_slice %66 {offsets = [32, 128], sizes = [8, 128], strides = [1, 1]} : vector<64x256xf32> to vector<8x128xf32>
    %152 = vector.broadcast %150 : vector<8x1xf32> to vector<8x128xf32>
    %153 = arith.mulf %152, %151 : vector<8x128xf32>
    %154 = arith.addf %149, %153 : vector<8x128xf32>
    %155 = arith.mulf %117, %130 : vector<8x1xf32>
    %156 = vector.extract_strided_slice %66 {offsets = [40, 128], sizes = [8, 128], strides = [1, 1]} : vector<64x256xf32> to vector<8x128xf32>
    %157 = vector.broadcast %155 : vector<8x1xf32> to vector<8x128xf32>
    %158 = arith.mulf %157, %156 : vector<8x128xf32>
    %159 = arith.addf %154, %158 : vector<8x128xf32>
    %160 = arith.mulf %119, %130 : vector<8x1xf32>
    %161 = vector.extract_strided_slice %66 {offsets = [48, 128], sizes = [8, 128], strides = [1, 1]} : vector<64x256xf32> to vector<8x128xf32>
    %162 = vector.broadcast %160 : vector<8x1xf32> to vector<8x128xf32>
    %163 = arith.mulf %162, %161 : vector<8x128xf32>
    %164 = arith.addf %159, %163 : vector<8x128xf32>
    %165 = arith.mulf %121, %130 : vector<8x1xf32>
    %166 = vector.extract_strided_slice %66 {offsets = [56, 128], sizes = [8, 128], strides = [1, 1]} : vector<64x256xf32> to vector<8x128xf32>
    %167 = vector.broadcast %165 : vector<8x1xf32> to vector<8x128xf32>
    %168 = arith.mulf %167, %166 : vector<8x128xf32>
    %169 = arith.addf %164, %168 : vector<8x128xf32>
    %c0_36 = arith.constant 0 : index
    %c0_37 = arith.constant 0 : index
    %170 = vector.load %arg13[%c0_36, %c0_37] : memref<128x128xf32, #tpu.memory_space<vmem>>, vector<128x128xf32>
    %cst_38 = arith.constant dense<0.000000e+00> : vector<8x128xf32>
    %171 = tpu.matmul %169, %170, %cst_38 {dimension_numbers = #tpu.dot_dimension_numbers<[1], [0], [0], [1], [0, 0, 1, 1], [], []>} : vector<8x128xf32>, vector<128x128xf32>, vector<8x128xf32> -> vector<8x128xf32>
    %c0_39 = arith.constant 0 : index
    %c0_40 = arith.constant 0 : index
    %172 = vector.load %arg14[%c0_39, %c0_40] : memref<1x128xf32, #tpu.memory_space<vmem>>, vector<1x128xf32>
    %173 = vector.broadcast %172 : vector<1x128xf32> to vector<8x128xf32>
    %174 = arith.addf %171, %173 : vector<8x128xf32>
    %c0_41 = arith.constant 0 : index
    %c0_42 = arith.constant 0 : index
    %175 = vector.load %arg5[%c0_41, %c0_42] : memref<1x128xf32, #tpu.memory_space<vmem>>, vector<1x128xf32>
    %c0_43 = arith.constant 0 : index
    %c0_44 = arith.constant 0 : index
    %176 = vector.load %arg6[%c0_43, %c0_44] : memref<1x128xf32, #tpu.memory_space<vmem>>, vector<1x128xf32>
    %cst_45 = arith.constant dense<0.000000e+00> : vector<8xf32>
    %177 = vector.multi_reduction <add>, %174, %cst_45 [1] : vector<8x128xf32> to vector<8xf32>
    %178 = vector.shape_cast %177 : vector<8xf32> to vector<8x1xf32>
    %cst_46 = arith.constant 3.125000e-02 : f32
    %179 = vector.broadcast %cst_46 : f32 to vector<8x1xf32>
    %180 = arith.mulf %178, %179 : vector<8x1xf32>
    %181 = vector.broadcast %180 : vector<8x1xf32> to vector<8x128xf32>
    %182 = arith.subf %174, %181 : vector<8x128xf32>
    %183 = vector.broadcast %4 : vector<1x128xf32> to vector<8x128xf32>
    %184 = arith.mulf %182, %183 : vector<8x128xf32>
    %185 = arith.mulf %184, %184 : vector<8x128xf32>
    %cst_47 = arith.constant dense<0.000000e+00> : vector<8xf32>
    %186 = vector.multi_reduction <add>, %185, %cst_47 [1] : vector<8x128xf32> to vector<8xf32>
    %187 = vector.shape_cast %186 : vector<8xf32> to vector<8x1xf32>
    %cst_48 = arith.constant 3.125000e-02 : f32
    %188 = vector.broadcast %cst_48 : f32 to vector<8x1xf32>
    %189 = arith.mulf %187, %188 : vector<8x1xf32>
    %cst_49 = arith.constant 9.99999974E-6 : f32
    %190 = vector.broadcast %cst_49 : f32 to vector<8x1xf32>
    %191 = arith.addf %189, %190 : vector<8x1xf32>
    %192 = math.rsqrt %191 : vector<8x1xf32>
    %193 = vector.broadcast %192 : vector<8x1xf32> to vector<8x128xf32>
    %194 = arith.mulf %184, %193 : vector<8x128xf32>
    %195 = vector.broadcast %175 : vector<1x128xf32> to vector<8x128xf32>
    %196 = arith.mulf %194, %195 : vector<8x128xf32>
    %197 = vector.broadcast %176 : vector<1x128xf32> to vector<8x128xf32>
    %198 = arith.addf %196, %197 : vector<8x128xf32>
    %c0_50 = arith.constant 0 : index
    %c0_51 = arith.constant 0 : index
    %199 = vector.load %arg15[%c0_50, %c0_51] : memref<128x128xf32, #tpu.memory_space<vmem>>, vector<128x128xf32>
    %cst_52 = arith.constant dense<0.000000e+00> : vector<8x128xf32>
    %200 = tpu.matmul %198, %199, %cst_52 {dimension_numbers = #tpu.dot_dimension_numbers<[1], [0], [0], [1], [0, 0, 1, 1], [], []>} : vector<8x128xf32>, vector<128x128xf32>, vector<8x128xf32> -> vector<8x128xf32>
    %c0_53 = arith.constant 0 : index
    %c0_54 = arith.constant 0 : index
    %201 = vector.load %arg16[%c0_53, %c0_54] : memref<1x128xf32, #tpu.memory_space<vmem>>, vector<1x128xf32>
    %202 = vector.broadcast %201 : vector<1x128xf32> to vector<8x128xf32>
    %203 = arith.addf %200, %202 : vector<8x128xf32>
    %204 = arith.addf %198, %203 : vector<8x128xf32>
    %c0_55 = arith.constant 0 : index
    %c0_56 = arith.constant 0 : index
    %205 = vector.load %arg7[%c0_55, %c0_56] : memref<1x128xf32, #tpu.memory_space<vmem>>, vector<1x128xf32>
    %c0_57 = arith.constant 0 : index
    %c0_58 = arith.constant 0 : index
    %206 = vector.load %arg8[%c0_57, %c0_58] : memref<1x128xf32, #tpu.memory_space<vmem>>, vector<1x128xf32>
    %cst_59 = arith.constant dense<0.000000e+00> : vector<8xf32>
    %207 = vector.multi_reduction <add>, %204, %cst_59 [1] : vector<8x128xf32> to vector<8xf32>
    %208 = vector.shape_cast %207 : vector<8xf32> to vector<8x1xf32>
    %cst_60 = arith.constant 3.125000e-02 : f32
    %209 = vector.broadcast %cst_60 : f32 to vector<8x1xf32>
    %210 = arith.mulf %208, %209 : vector<8x1xf32>
    %211 = vector.broadcast %210 : vector<8x1xf32> to vector<8x128xf32>
    %212 = arith.subf %204, %211 : vector<8x128xf32>
    %213 = vector.broadcast %4 : vector<1x128xf32> to vector<8x128xf32>
    %214 = arith.mulf %212, %213 : vector<8x128xf32>
    %215 = arith.mulf %214, %214 : vector<8x128xf32>
    %cst_61 = arith.constant dense<0.000000e+00> : vector<8xf32>
    %216 = vector.multi_reduction <add>, %215, %cst_61 [1] : vector<8x128xf32> to vector<8xf32>
    %217 = vector.shape_cast %216 : vector<8xf32> to vector<8x1xf32>
    %cst_62 = arith.constant 3.125000e-02 : f32
    %218 = vector.broadcast %cst_62 : f32 to vector<8x1xf32>
    %219 = arith.mulf %217, %218 : vector<8x1xf32>
    %cst_63 = arith.constant 9.99999974E-6 : f32
    %220 = vector.broadcast %cst_63 : f32 to vector<8x1xf32>
    %221 = arith.addf %219, %220 : vector<8x1xf32>
    %222 = math.rsqrt %221 : vector<8x1xf32>
    %223 = vector.broadcast %222 : vector<8x1xf32> to vector<8x128xf32>
    %224 = arith.mulf %214, %223 : vector<8x128xf32>
    %225 = vector.broadcast %205 : vector<1x128xf32> to vector<8x128xf32>
    %226 = arith.mulf %224, %225 : vector<8x128xf32>
    %227 = vector.broadcast %206 : vector<1x128xf32> to vector<8x128xf32>
    %228 = arith.addf %226, %227 : vector<8x128xf32>
    %c0_64 = arith.constant 0 : index
    %c0_65 = arith.constant 0 : index
    %229 = vector.load %arg17[%c0_64, %c0_65] : memref<8x128xf32, #tpu.memory_space<vmem>>, vector<8x128xf32>
    tpu.vector_store %arg17[%c0_64, %c0_65], %228 {strides = array<i32>} : memref<8x128xf32, #tpu.memory_space<vmem>>, vector<8x128xf32>,
    return
  }
  func.func @transform_0(%arg0: i32) -> (i32, i32) {
    %c0_i32 = arith.constant 0 : i32
    %c0_i32_0 = arith.constant 0 : i32
    return %arg0, %c0_i32 : i32, i32
  }
  func.func @transform_1(%arg0: i32) -> (i32, i32, i32) {
    %c0_i32 = arith.constant 0 : i32
    %c0_i32_0 = arith.constant 0 : i32
    %c0_i32_1 = arith.constant 0 : i32
    return %c0_i32, %arg0, %c0_i32_0 : i32, i32, i32
  }
  func.func @transform_2(%arg0: i32) -> (i32, i32) {
    %c0_i32 = arith.constant 0 : i32
    %c0_i32_0 = arith.constant 0 : i32
    %c0_i32_1 = arith.constant 0 : i32
    return %c0_i32, %c0_i32_0 : i32, i32
  }
  func.func @transform_3(%arg0: i32) -> (i32, i32) {
    %c0_i32 = arith.constant 0 : i32
    %c0_i32_0 = arith.constant 0 : i32
    %c0_i32_1 = arith.constant 0 : i32
    return %c0_i32, %c0_i32_0 : i32, i32
  }
  func.func @transform_4(%arg0: i32) -> (i32, i32) {
    %c0_i32 = arith.constant 0 : i32
    %c0_i32_0 = arith.constant 0 : i32
    %c0_i32_1 = arith.constant 0 : i32
    return %c0_i32, %c0_i32_0 : i32, i32
  }
  func.func @transform_5(%arg0: i32) -> (i32, i32) {
    %c0_i32 = arith.constant 0 : i32
    %c0_i32_0 = arith.constant 0 : i32
    %c0_i32_1 = arith.constant 0 : i32
    return %c0_i32, %c0_i32_0 : i32, i32
  }
  func.func @transform_6(%arg0: i32) -> (i32, i32) {
    %c0_i32 = arith.constant 0 : i32
    %c0_i32_0 = arith.constant 0 : i32
    %c0_i32_1 = arith.constant 0 : i32
    return %c0_i32, %c0_i32_0 : i32, i32
  }
  func.func @transform_7(%arg0: i32) -> (i32, i32) {
    %c0_i32 = arith.constant 0 : i32
    %c0_i32_0 = arith.constant 0 : i32
    %c0_i32_1 = arith.constant 0 : i32
    return %c0_i32, %c0_i32_0 : i32, i32
  }
  func.func @transform_8(%arg0: i32) -> (i32, i32) {
    %c0_i32 = arith.constant 0 : i32
    %c0_i32_0 = arith.constant 0 : i32
    %c0_i32_1 = arith.constant 0 : i32
    return %c0_i32, %c0_i32_0 : i32, i32
  }
  func.func @transform_9(%arg0: i32) -> (i32, i32) {
    %c0_i32 = arith.constant 0 : i32
    %c0_i32_0 = arith.constant 0 : i32
    %c0_i32_1 = arith.constant 0 : i32
    return %c0_i32, %c0_i32_0 : i32, i32
  }
  func.func @transform_10(%arg0: i32) -> (i32, i32) {
    %c0_i32 = arith.constant 0 : i32
    %c0_i32_0 = arith.constant 0 : i32
    %c0_i32_1 = arith.constant 0 : i32
    return %c0_i32, %c0_i32_0 : i32, i32
  }
  func.func @transform_11(%arg0: i32) -> (i32, i32) {
    %c0_i32 = arith.constant 0 : i32
    %c0_i32_0 = arith.constant 0 : i32
    %c0_i32_1 = arith.constant 0 : i32
    return %c0_i32, %c0_i32_0 : i32, i32
  }
  func.func @transform_12(%arg0: i32) -> (i32, i32) {
    %c0_i32 = arith.constant 0 : i32
    %c0_i32_0 = arith.constant 0 : i32
    %c0_i32_1 = arith.constant 0 : i32
    return %c0_i32, %c0_i32_0 : i32, i32
  }
  func.func @transform_13(%arg0: i32) -> (i32, i32) {
    %c0_i32 = arith.constant 0 : i32
    %c0_i32_0 = arith.constant 0 : i32
    %c0_i32_1 = arith.constant 0 : i32
    return %c0_i32, %c0_i32_0 : i32, i32
  }
  func.func @transform_14(%arg0: i32) -> (i32, i32) {
    %c0_i32 = arith.constant 0 : i32
    %c0_i32_0 = arith.constant 0 : i32
    %c0_i32_1 = arith.constant 0 : i32
    return %c0_i32, %c0_i32_0 : i32, i32
  }
  func.func @transform_15(%arg0: i32) -> (i32, i32) {
    %c0_i32 = arith.constant 0 : i32
    %c0_i32_0 = arith.constant 0 : i32
    %c0_i32_1 = arith.constant 0 : i32
    return %c0_i32, %c0_i32_0 : i32, i32
  }
  func.func @transform_16(%arg0: i32) -> (i32, i32) {
    %c0_i32 = arith.constant 0 : i32
    %c0_i32_0 = arith.constant 0 : i32
    return %arg0, %c0_i32 : i32, i32
  }
}

</mosaic_0001>

<bundles_post_ra>
// kernel: tpu_custom_call.1
= control target key start
LH: loop header
LB: loop body
LE: loop exit
PB: predicated region body
PF: predicated region fallthrough
CT: control target
= control target key end

     0   :  { %s1589_s0 = inlined_call_operand.hbm [shape: f32[8,128], index: 0, kind: input, shape index: {}]   ;;  %s1590_s1 = inlined_call_operand.hbm [shape: f32[8,8,128], index: 1, kind: input, shape index: {}]   ;;  %s1591_s2 = inlined_call_operand.vmem [shape: f32[1,128], index: 2, kind: input, shape index: {}]   ;;  %s1592_s3 = inlined_call_operand.vmem [shape: f32[1,128], index: 3, kind: input, shape index: {}]   ;;  %s1593_s4 = inlined_call_operand.vmem [shape: f32[1,128], index: 4, kind: input, shape index: {}]   ;;  %s1594_s5 = inlined_call_operand.vmem [shape: f32[1,128], index: 5, kind: input, shape index: {}]   ;;  %s1595_s6 = inlined_call_operand.vmem [shape: f32[1,128], index: 6, kind: input, shape index: {}]   ;;  %s1596_s7 = inlined_call_operand.vmem [shape: f32[1,128], index: 7, kind: input, shape index: {}]   ;;  %s1597_s8 = inlined_call_operand.hbm [shape: f32[128,128], index: 8, kind: input, shape index: {}]   ;;  %s1598_s9 = inlined_call_operand.vmem [shape: f32[1,128], index: 9, kind: input, shape index: {}]   ;;  %s1599_s10 = inlined_call_operand.hbm [shape: f32[128,256], index: 10, kind: input, shape index: {}]   ;;  %s1600_s11 = inlined_call_operand.vmem [shape: f32[1,256], index: 11, kind: input, shape index: {}]   ;;  %s1601_s12 = inlined_call_operand.hbm [shape: f32[128,128], index: 12, kind: input, shape index: {}]   ;;  %s1602_s13 = inlined_call_operand.vmem [shape: f32[1,128], index: 13, kind: input, shape index: {}]   ;;  %s1603_s14 = inlined_call_operand.hbm [shape: f32[128,128], index: 14, kind: input, shape index: {}]   ;;  %s1604_s15 = inlined_call_operand.vmem [shape: f32[1,128], index: 15, kind: input, shape index: {}]   ;;  %s1605_s16 = inlined_call_operand.hbm [shape: f32[8,128], index: 16, kind: output, shape index: {}]  }
   0x1   :  { %1606 = sst [smem:[#allocation19_spill]] %s1589_s0 }
   0x2   :  { %21 = vsyncpa [#allocation3], 0 }
   0x3   :  { %22 = vsyncpa [#allocation6], 0 }
   0x4   :  { %23 = vsyncpa [#allocation9], 0 }
   0x5   :  { %24 = vsyncpa [#allocation12], 0 }
   0x6   :  { %25 = vsyncpa [#allocation4], 0  ;;  %s1256_s21 = smov [#allocation5]  }
   0x7   :  { %s41_s22 = sshll.u32 %s1256_s21, 4  ;;  %s42_s22 = int_to_ptr.vmem [resolvable:$true] %s41_s22 }
   0x8   :  { %s1114_s23 = scalar_lea.vmem %s42_s22, 1024  ;;  %p1119_p1 = scmp.lt.s32.totalorder %s42_s22, %s42_s22 }
   0x9   :  { %p1115_p0 = scmp.ne.s32.totalorder %s42_s22, %s1114_s23  ;;  %p1120_p2 = scmp.lt.s32.totalorder %s1114_s23, %s1114_s23 }
   0xb   :  { %p1121_p3 = por %p1120_p2, %p1119_p1 }
   0xd   :  { %p1122_p4 = pnand %p1121_p3, %p1115_p0 }
   0xf   :  { %1125 = shalt.err (!%p1122_p4)
}
  0x10   :  { %s1257_s24 = smov 128   ;;  %s1258_s25 = smov 8  }
  0x11   :  { %47 = dma.hbm_to_vmem [thread:$0]  %s1590_s1, 1024, %s42_s22, [#allocation6], %s1257_s24, %s1257_s24, %s1258_s25  }
  0x12   :  { %s1259_s28 = smov [#allocation8]  }
  0x13   :  { %s79_s29 = sshll.u32 %s1259_s28, 4  ;;  %s80_s29 = int_to_ptr.vmem [resolvable:$true] %s79_s29 }
  0x14   :  { %s1134_s30 = scalar_lea.vmem %s80_s29, 4096  ;;  %p1139_p6 = scmp.lt.s32.totalorder %s80_s29, %s80_s29 }
  0x15   :  { %p1135_p5 = scmp.ne.s32.totalorder %s80_s29, %s1134_s30  ;;  %p1140_p7 = scmp.lt.s32.totalorder %s1134_s30, %s1134_s30 }
  0x17   :  { %p1141_p8 = por %p1140_p7, %p1139_p6 }
  0x19   :  { %p1142_p9 = pnand %p1141_p8, %p1135_p5 }
  0x1b   :  { %1145 = shalt.err (!%p1142_p9)
}
  0x1c   :  { %s1260_s0 = smov 256   ;;  %s1261_s17 = smov 16  }
  0x1d   :  { %85 = dma.hbm_to_vmem [thread:$0]  %s1599_s10, 4096, %s80_s29, [#allocation9], %s1260_s0, %s1260_s0, %s1261_s17  }
  0x1e   :  { %s1262_s20 = smov [#allocation2]   ;;  %s1263_s23 = smov [#allocation7]  }
  0x1f   :  { %s32_s21 = sshll.u32 %s1262_s20, 4  ;;  %s65_s1 = sshll.u32 %s1263_s23, 4  ;;  %s33_s21 = int_to_ptr.vmem [resolvable:$true] %s32_s21  ;;  %s66_s1 = int_to_ptr.vmem [resolvable:$true] %s65_s1 }
  0x20   :  { %s1154_s22 = scalar_lea.vmem %s33_s21, 128  ;;  %p1159_p11 = scmp.lt.s32.totalorder %s33_s21, %s33_s21 }
  0x21   :  { %p1155_p10 = scmp.ne.s32.totalorder %s33_s21, %s1154_s22  ;;  %p1160_p12 = scmp.lt.s32.totalorder %s1154_s22, %s1154_s22 }
  0x23   :  { %p1161_p13 = por %p1160_p12, %p1159_p11 }
  0x25   :  { %p1162_p0 = pnand %p1161_p13, %p1155_p10 }
  0x27   :  { %1165 = shalt.err (!%p1162_p0)
}
  0x28   :  { %s1607_s28 = sld [smem:[#allocation19_spill]]  ;;  %s1174_s30 = scalar_lea.vmem %s66_s1, 2048 }
  0x29   :  { %p1175_p1 = scmp.ne.s32.totalorder %s66_s1, %s1174_s30  ;;  %p1179_p2 = scmp.lt.s32.totalorder %s66_s1, %s66_s1 }
  0x2a   :  { %p1180_p3 = scmp.lt.s32.totalorder %s1174_s30, %s1174_s30 }
  0x2c   :  { %p1181_p4 = por %p1180_p3, %p1179_p2 }
  0x2e   :  { %35 = dma.hbm_to_vmem [thread:$0]  %s1607_s28, 128, %s33_s21, [#allocation3]  }
  0x2f   :  { %p1182_p5 = pnand %p1181_p4, %p1175_p1 }
  0x31   :  { %1185 = shalt.err (!%p1182_p5)
}
  0x32   :  { %71 = dma.hbm_to_vmem [thread:$0]  %s1597_s8, 2048, %s66_s1, [#allocation6], %s1257_s24, %s1257_s24, %s1258_s25  }
  0x33   :  { %s1264_s0 = smov [#allocation10]   ;;  %s1265_s18 = smov [#allocation11]  }
  0x34   :  { %s93_s17 = sshll.u32 %s1264_s0, 4  ;;  %s107_s19 = sshll.u32 %s1265_s18, 4  ;;  %s94_s17 = int_to_ptr.vmem [resolvable:$true] %s93_s17  ;;  %s108_s19 = int_to_ptr.vmem [resolvable:$true] %s107_s19 }
  0x35   :  { %s1194_s20 = scalar_lea.vmem %s94_s17, 2048  ;;  %p1199_p7 = scmp.lt.s32.totalorder %s94_s17, %s94_s17 }
  0x36   :  { %p1195_p6 = scmp.ne.s32.totalorder %s94_s17, %s1194_s20  ;;  %p1200_p8 = scmp.lt.s32.totalorder %s1194_s20, %s1194_s20 }
  0x38   :  { %p1201_p9 = por %p1200_p8, %p1199_p7 }
  0x3a   :  { %p1202_p10 = pnand %p1201_p9, %p1195_p6 }
  0x3c   :  { %1205 = shalt.err (!%p1202_p10)
}
  0x3d   :  { %99 = dma.hbm_to_vmem [thread:$0]  %s1601_s12, 2048, %s94_s17, [#allocation9], %s1257_s24, %s1257_s24, %s1258_s25  }
  0x3e   :  { %s1214_s8 = scalar_lea.vmem %s108_s19, 2048  ;;  %p1219_p12 = scmp.lt.s32.totalorder %s108_s19, %s108_s19 }
  0x3f   :  { %p1215_p11 = scmp.ne.s32.totalorder %s108_s19, %s1214_s8  ;;  %p1220_p13 = scmp.lt.s32.totalorder %s1214_s8, %s1214_s8 }
  0x41   :  { %p1221_p0 = por %p1220_p13, %p1219_p12 }
  0x43   :  { %p1222_p1 = pnand %p1221_p0, %p1215_p11 }
  0x45   :  { %1225 = shalt.err (!%p1222_p1)
}
  0x46   :  { %113 = dma.hbm_to_vmem [thread:$0]  %s1603_s14, 2048, %s108_s19, [#allocation12], %s1257_s24, %s1257_s24, %s1258_s25  }
  0x47   :  { %1246 = dma.done.wait [#allocation3], 128  }
  0x48   :  { %1247 = vsyncadd [#allocation3], 4294967168 }
  0x49   :  { %1248 = dma.done.wait [#allocation6], 3072  }
  0x4a   :  { %1249 = vsyncadd [#allocation6], 4294964224 }
  0x4b   :  { %1250 = dma.done.wait [#allocation9], 6144  }
  0x4c   :  { %1251 = vsyncadd [#allocation9], 4294961152 }
  0x4d   :  { %1252 = dma.done.wait [#allocation12], 2048  }
  0x4e   :  { %1253 = vsyncadd [#allocation12], 4294965248  ;;  %v168_v0 = vld [vmem:[#allocation5] sm:$0xff]  ;;  %v170_v1 = vld [vmem:[#allocation5 + $0x10] sm:$0xff]  ;;  %v1266_v9 = vmov 0.0   ;;  %v134_v18 = vlaneseq  ;;  %vm1267_vm1 = vmmov 0  }
  0x4f   :  { %176 = vadd.xlane.f32.xlu0 %v168_v0  ;;  %180 = vadd.xlane.f32.xlu1 %v170_v1  ;;  %v169_v2 = vld [vmem:[#allocation5 + $0x8] sm:$0xff]  ;;  %v171_v3 = vld [vmem:[#allocation5 + $0x18] sm:$0xff]  ;;  %v1386_v5 = vld [vmem:[#allocation5 + $0x20] sm:$0xff]  ;;  %s1268_s18 = smov [#allocation13]  }
  0x50   :  { %v1384_v4 = vld [vmem:[#allocation2] sm:$0xff]  ;;  %v1390_v6 = vld [vmem:[#allocation5 + $0x28] sm:$0xff]  ;;  %v1392_v7 = vld [vmem:[#allocation5 + $0x30] sm:$0xff]  ;;  %948 = vmatprep.subr.mxu0 %v1266_v9  ;;  %489 = vmatprep.mubr.f32.mxu1 %v1266_v9  ;;  %v135_v19 = vand.u32 127, %v134_v18  ;;  %s875_s19 = sshll.u32 %s1268_s18, 4  ;;  %s876_s19 = int_to_ptr.vmem [resolvable:$true] %s875_s19 }
  0x51   :  { %v1396_v8 = vld [vmem:[#allocation5 + $0x38] sm:$0xff]  ;;  %v411_v11 = vld [vmem:[#allocation8 + $0xf0] sm:$0xff]  ;;  %v410_v12 = vld [vmem:[#allocation8 + $0xe8] sm:$0xff]  ;;  %980 = vmatprep.mubr.msk.f32.mxu0 %vm1267_vm1, %v1266_v9  ;;  %s1226_s20 = scalar_lea.vmem %s876_s19, 128  ;;  %p1231_p3 = scmp.lt.s32.totalorder %s876_s19, %s876_s19 }
  0x52   :  { %v412_v10 = vld [vmem:[#allocation8 + $0xf8] sm:$0xff]  ;;  %v409_v13 = vld [vmem:[#allocation8 + $0xe0] sm:$0xff]  ;;  %v407_v15 = vld [vmem:[#allocation8 + $0xd0] sm:$0xff]  ;;  %vm136_vm0 = vcmp.lt.s32.totalorder %v135_v19, 32  ;;  %p1227_p2 = scmp.ne.s32.totalorder %s876_s19, %s1226_s20  ;;  %p1232_p4 = scmp.lt.s32.totalorder %s1226_s20, %s1226_s20 }
  0x53   :  { %178 = vadd.xlane.f32.xlu0 %v169_v2  ;;  %182 = vadd.xlane.f32.xlu1 %v171_v3  ;;  %v408_v14 = vld [vmem:[#allocation8 + $0xd8] sm:$0xff]  ;;  %v406_v16 = vld [vmem:[#allocation8 + $0xc8] sm:$0xff]  ;;  %v405_v17 = vld [vmem:[#allocation8 + $0xc0] sm:$0xff]  ;;  %v1403_v24 = vsel %vm136_vm0, 1.0, %v1266_v9 }
  0x54   :  { %425 = vmatprep.subr.mxu1 %v412_v10  ;;  %v404_v61 = vld [vmem:[#allocation8 + $0xb8] sm:$0xff]  ;;  %v301_v10 = vld [vmem:[#allocation7 + $0x68] sm:$0xff]  ;;  %p1233_p5 = por %p1232_p4, %p1231_p3 }
  0x55   :  { %426 = vmatpush1.msra.mxu1 %v411_v11  ;;  %v399_v11 = vld [vmem:[#allocation8 + $0x90] sm:$0xff]  ;;  %v394_v19 = vld [vmem:[#allocation8 + $0x68] sm:$0xff] }
  0x56   :  { %427 = vmatprep.subr.mxu1 %v410_v12  ;;  %v398_v12 = vld [vmem:[#allocation8 + $0x88] sm:$0xff]  ;;  %p1234_p6 = pnand %p1233_p5, %p1227_p2 }
  0x57   :  { %142 = vadd.xlane.f32.xlu0 %v1384_v4  ;;  %184 = vadd.xlane.f32.xlu1 %v1386_v5 }
  0x58   :  { %428 = vmatpush1.msra.mxu1 %v409_v13  ;;  %v300_v13 = vld [vmem:[#allocation7 + $0x60] sm:$0xff] }
  0x59   :  { %429 = vmatprep.subr.mxu1 %v408_v14  ;;  %v397_v14 = vld [vmem:[#allocation8 + $0x80] sm:$0xff] }
  0x5a   :  { %430 = vmatpush1.msra.mxu1 %v407_v15  ;;  %v396_v15 = vld [vmem:[#allocation8 + $0x78] sm:$0xff] }
  0x5b   :  { %186 = vadd.xlane.f32.xlu0 %v1390_v6  ;;  %188 = vadd.xlane.f32.xlu1 %v1392_v7 }
  0x5c   :  { %431 = vmatprep.subr.mxu1 %v406_v16  ;;  %v299_v16 = vld [vmem:[#allocation7 + $0x58] sm:$0xff] }
  0x5d   :  { %432 = vmatpush1.msra.mxu1 %v405_v17  ;;  %v395_v17 = vld [vmem:[#allocation8 + $0x70] sm:$0xff] }
  0x5e   :  { %433 = vmatprep.subr.mxu1 %v404_v61 }
  0x5f   :  { %190 = vadd.xlane.f32.xlu0 %v1396_v8 }
  0xd8   :  { %v177_v20 = vpop.xlane.xlu0 %176  ;;  %v181_v21 = vpop.xlane.xlu1 %180 }
  0xd9   :  { %v192_v22 = vmul.f32 0.03125, %v177_v20  ;;  %v194_v23 = vmul.f32 0.03125, %v181_v21  ;;  %v298_v20 = vld [vmem:[#allocation7 + $0x50] sm:$0xff]  ;;  %v393_v21 = vld [vmem:[#allocation8 + $0x60] sm:$0xff] }
  0xdb   :  { %v200_v25 = vsub.f32 %v168_v0, %v192_v22  ;;  %v202_v26 = vsub.f32 %v170_v1, %v194_v23  ;;  %v303_v0 = vld [vmem:[#allocation7 + $0x78] sm:$0xff]  ;;  %v403_v1 = vld [vmem:[#allocation8 + $0xb0] sm:$0xff]  ;;  %v297_v23 = vld [vmem:[#allocation7 + $0x48] sm:$0xff] }
  0xdc   :  { %v179_v27 = vpop.xlane.xlu0 %178  ;;  %v183_v28 = vpop.xlane.xlu1 %182  ;;  %949 = vmatpush3.msra.mxu0 %v303_v0  ;;  %434 = vmatpush1.msra.mxu1 %v403_v1  ;;  %v392_v22 = vld [vmem:[#allocation8 + $0x58] sm:$0xff] }
  0xdd   :  { %v193_v29 = vmul.f32 0.03125, %v179_v27  ;;  %v195_v30 = vmul.f32 0.03125, %v183_v28  ;;  %v1406_v31 = vmul.f32 %v1403_v24, %v200_v25  ;;  %v1409_v32 = vmul.f32 %v1403_v24, %v202_v26  ;;  %950 = vmatprep.subr.mxu0 %v1266_v9  ;;  %v391_v25 = vld [vmem:[#allocation8 + $0x50] sm:$0xff]  ;;  %v390_v26 = vld [vmem:[#allocation8 + $0x48] sm:$0xff]  ;;  %v296_v27 = vld [vmem:[#allocation7 + $0x40] sm:$0xff] }
  0xde   :  { %v389_v28 = vld [vmem:[#allocation8 + $0x40] sm:$0xff] }
  0xdf   :  { %v201_v33 = vsub.f32 %v169_v2, %v193_v29  ;;  %v203_v34 = vsub.f32 %v171_v3, %v195_v30  ;;  %v216_v35 = vmul.f32 %v1406_v31, %v1406_v31  ;;  %v218_v38 = vmul.f32 %v1409_v32, %v1409_v32  ;;  %v402_v2 = vld [vmem:[#allocation8 + $0xa8] sm:$0xff]  ;;  %v388_v29 = vld [vmem:[#allocation8 + $0x38] sm:$0xff] }
  0xe0   :  { %v143_v36 = vpop.xlane.xlu0 %142  ;;  %v185_v37 = vpop.xlane.xlu1 %184  ;;  %435 = vmatprep.subr.mxu1 %v402_v2  ;;  %v295_v30 = vld [vmem:[#allocation7 + $0x38] sm:$0xff] }
  0xe1   :  { %v144_v39 = vmul.f32 0.03125, %v143_v36  ;;  %224 = vadd.xlane.f32.xlu1 %v216_v35  ;;  %v196_v40 = vmul.f32 0.03125, %v185_v37  ;;  %v1416_v41 = vmul.f32 %v1403_v24, %v201_v33  ;;  %v1419_v42 = vmul.f32 %v1403_v24, %v203_v34  ;;  %v387_v33 = vld [vmem:[#allocation8 + $0x30] sm:$0xff]  ;;  %v386_v34 = vld [vmem:[#allocation8 + $0x28] sm:$0xff]  ;;  %v385_v36 = vld [vmem:[#allocation8 + $0x20] sm:$0xff] }
  0xe2   :  { %v294_v35 = vld [vmem:[#allocation7 + $0x30] sm:$0xff]  ;;  %v384_v37 = vld [vmem:[#allocation8 + $0x18] sm:$0xff] }
  0xe3   :  { %v145_v43 = vsub.f32 %v1384_v4, %v144_v39  ;;  %v204_v44 = vsub.f32 %v1386_v5, %v196_v40  ;;  %v217_v45 = vmul.f32 %v1416_v41, %v1416_v41  ;;  %v219_v48 = vmul.f32 %v1419_v42, %v1419_v42  ;;  %v302_v5 = vld [vmem:[#allocation7 + $0x70] sm:$0xff]  ;;  %v382_v40 = vld [vmem:[#allocation8 + $0x8] sm:$0xff] }
  0xe4   :  { %v187_v46 = vpop.xlane.xlu0 %186  ;;  %v189_v47 = vpop.xlane.xlu1 %188  ;;  %951 = vmatpush3.msra.mxu0 %v302_v5  ;;  %v383_v39 = vld [vmem:[#allocation8 + $0x10] sm:$0xff] }
  0xe5   :  { %v197_v49 = vmul.f32 0.03125, %v187_v46  ;;  %228 = vadd.xlane.f32.xlu1 %v218_v38  ;;  %226 = vadd.xlane.f32.xlu0 %v217_v45  ;;  %v198_v50 = vmul.f32 0.03125, %v189_v47  ;;  %v1428_v51 = vmul.f32 %v1403_v24, %v145_v43  ;;  %v1431_v52 = vmul.f32 %v1403_v24, %v204_v44  ;;  %v293_v38 = vld [vmem:[#allocation7 + $0x28] sm:$0xff]  ;;  %v292_v43 = vld [vmem:[#allocation7 + $0x20] sm:$0xff]  ;;  %v291_v45 = vld [vmem:[#allocation7 + $0x18] sm:$0xff] }
  0xe6   :  { %952 = vmatprep.subr.mxu0 %v1266_v9  ;;  %v381_v44 = vld [vmem:[#allocation8] sm:$0xff]  ;;  %v290_v46 = vld [vmem:[#allocation7 + $0x10] sm:$0xff]  ;;  %v289_v47 = vld [vmem:[#allocation7 + $0x8] sm:$0xff] }
  0xe7   :  { %v205_v53 = vsub.f32 %v1390_v6, %v197_v49  ;;  %v206_v54 = vsub.f32 %v1392_v7, %v198_v50  ;;  %v147_v55 = vmul.f32 %v1428_v51, %v1428_v51  ;;  %v220_v58 = vmul.f32 %v1431_v52, %v1431_v52  ;;  %v401_v6 = vld [vmem:[#allocation8 + $0xa0] sm:$0xff]  ;;  %953 = vmatpush3.msra.mxu0 %v301_v10 }
  0xe8   :  { %v191_v56 = vpop.xlane.xlu0 %190  ;;  %436 = vmatpush1.msra.mxu1 %v401_v6  ;;  %954 = vmatprep.subr.mxu0 %v1266_v9 }
  0xe9   :  { %v199_v57 = vmul.f32 0.03125, %v191_v56  ;;  %230 = vadd.xlane.f32.xlu0 %v219_v48  ;;  %148 = vadd.xlane.f32.xlu1 %v147_v55  ;;  %v1440_v59 = vmul.f32 %v1403_v24, %v205_v53  ;;  %v1443_v60 = vmul.f32 %v1403_v24, %v206_v54  ;;  %v288_v48 = vld [vmem:[#allocation7] sm:$0xff] }
  0xea   :  { %955 = vmatpush3.msra.mxu0 %v300_v13 }
  0xeb   :  { %v207_v62 = vsub.f32 %v1396_v8, %v199_v57  ;;  %v221_v63 = vmul.f32 %v1440_v59, %v1440_v59  ;;  %v222_v3 = vmul.f32 %v1443_v60, %v1443_v60  ;;  %v400_v8 = vld [vmem:[#allocation8 + $0x98] sm:$0xff]  ;;  %956 = vmatprep.subr.mxu0 %v1266_v9 }
  0xec   :  { %437 = vmatprep.subr.mxu1 %v400_v8  ;;  %957 = vmatpush3.msra.mxu0 %v299_v16  ;;  %v888_v16 = vld [vmem:[%s1591_s2] ss:$0 sm:$0xff] }
  0xed   :  { %232 = vadd.xlane.f32.xlu0 %v220_v58  ;;  %234 = vadd.xlane.f32.xlu1 %v221_v63  ;;  %v1451_v4 = vmul.f32 %v1403_v24, %v207_v62 }
  0xee   :  { %438 = vmatpush1.msra.mxu1 %v399_v11  ;;  %958 = vmatprep.subr.mxu0 %v1266_v9 }
  0xef   :  { %v223_v7 = vmul.f32 %v1451_v4, %v1451_v4  ;;  %439 = vmatprep.subr.mxu1 %v398_v12  ;;  %959 = vmatpush3.msra.mxu0 %v298_v20 }
  0xf0   :  { %440 = vmatpush1.msra.mxu1 %v397_v14  ;;  %960 = vmatprep.subr.mxu0 %v1266_v9 }
  0xf1   :  { %236 = vadd.xlane.f32.xlu0 %v222_v3  ;;  %238 = vadd.xlane.f32.xlu1 %v223_v7 }
  0xf2   :  { %441 = vmatprep.subr.mxu1 %v396_v15  ;;  %961 = vmatpush3.msra.mxu0 %v297_v23 }
  0xf3   :  { %442 = vmatpush1.msra.mxu1 %v395_v17  ;;  %962 = vmatprep.subr.mxu0 %v1266_v9 }
  0xf4   :  { %443 = vmatprep.subr.mxu1 %v394_v19  ;;  %963 = vmatpush3.msra.mxu0 %v296_v27 }
  0xf5   :  { %444 = vmatpush1.msra.mxu1 %v393_v21  ;;  %964 = vmatprep.subr.mxu0 %v1266_v9  ;;  %v889_v21 = vld [vmem:[%s1592_s3] ss:$0 sm:$0xff] }
  0xf6   :  { %445 = vmatprep.subr.mxu1 %v392_v22  ;;  %965 = vmatpush3.msra.mxu0 %v295_v30 }
  0xf7   :  { %446 = vmatpush1.msra.mxu1 %v391_v25  ;;  %966 = vmatprep.subr.mxu0 %v1266_v9 }
  0xf8   :  { %447 = vmatprep.subr.mxu1 %v390_v26  ;;  %967 = vmatpush3.msra.mxu0 %v294_v35 }
  0xf9   :  { %448 = vmatpush1.msra.mxu1 %v389_v28  ;;  %968 = vmatprep.subr.mxu0 %v1266_v9 }
  0xfa   :  { %449 = vmatprep.subr.mxu1 %v388_v29  ;;  %969 = vmatpush3.msra.mxu0 %v293_v38 }
  0xfb   :  { %450 = vmatpush1.msra.mxu1 %v387_v33  ;;  %970 = vmatprep.subr.mxu0 %v1266_v9 }
  0xfc   :  { %451 = vmatprep.subr.mxu1 %v386_v34  ;;  %971 = vmatpush3.msra.mxu0 %v292_v43 }
  0xfd   :  { %452 = vmatpush1.msra.mxu1 %v385_v36  ;;  %972 = vmatprep.subr.mxu0 %v1266_v9 }
  0xfe   :  { %453 = vmatprep.subr.mxu1 %v384_v37  ;;  %973 = vmatpush3.msra.mxu0 %v291_v45 }
  0xff   :  { %454 = vmatpush1.msra.mxu1 %v383_v39  ;;  %974 = vmatprep.subr.mxu0 %v1266_v9 }
 0x100   :  { %455 = vmatprep.subr.mxu1 %v382_v40  ;;  %975 = vmatpush3.msra.mxu0 %v290_v46 }
 0x101   :  { %456 = vmatpush1.msra.mxu1 %v381_v44  ;;  %976 = vmatprep.subr.mxu0 %v1266_v9 }
 0x102   :  { %1018 = vmatprep.subr.mxu1 %v1266_v9  ;;  %977 = vmatpush3.msra.mxu0 %v289_v47 }
 0x103   :  { %978 = vmatprep.subr.mxu0 %v1266_v9 }
 0x104   :  { %979 = vmatpush3.msra.mxu0 %v288_v48 }
 0x105   :  { %983 = vmatprep.subr.mxu0 %v1266_v9 }
 0x16a   :  { %v225_v49 = vpop.xlane.xlu1 %224 }
 0x16b   :  { %v240_v50 = vmul.f32 0.03125, %v225_v49 }
 0x16d   :  { %v248_v53 = vadd.f32 1e-05, %v240_v50 }
 0x16e   :  { %v229_v54 = vpop.xlane.xlu1 %228  ;;  %v227_v55 = vpop.xlane.xlu0 %226 }
 0x16f   :  { %1066 = vrsqrt.f32 %v248_v53  ;;  %v242_v56 = vmul.f32 0.03125, %v229_v54  ;;  %v241_v57 = vmul.f32 0.03125, %v227_v55 }
 0x171   :  { %v250_v58 = vadd.f32 1e-05, %v242_v56  ;;  %v249_v61 = vadd.f32 1e-05, %v241_v57 }
 0x172   :  { %v149_v62 = vpop.xlane.xlu1 %148  ;;  %v231_v63 = vpop.xlane.xlu0 %230 }
 0x173   :  { %1068 = vrsqrt.f32 %v250_v58  ;;  %v150_v0 = vmul.f32 0.03125, %v149_v62  ;;  %v243_v1 = vmul.f32 0.03125, %v231_v63 }
 0x174   :  { %1070 = vrsqrt.f32 %v249_v61 }
 0x175   :  { %v151_v2 = vadd.f32 1e-05, %v150_v0  ;;  %v251_v3 = vadd.f32 1e-05, %v243_v1  ;;  %v890_v0 = vld [vmem:[%s1598_s9] ss:$0 sm:$0xff] }
 0x176   :  { %v235_v5 = vpop.xlane.xlu1 %234  ;;  %v233_v6 = vpop.xlane.xlu0 %232 }
 0x177   :  { %1072 = vrsqrt.f32 %v151_v2  ;;  %v245_v7 = vmul.f32 0.03125, %v235_v5  ;;  %v244_v8 = vmul.f32 0.03125, %v233_v6 }
 0x178   :  { %1074 = vrsqrt.f32 %v251_v3 }
 0x179   :  { %v252_v10 = vadd.f32 1e-05, %v244_v8  ;;  %v253_v11 = vadd.f32 1e-05, %v245_v7 }
 0x17a   :  { %v237_v12 = vpop.xlane.xlu0 %236  ;;  %v239_v13 = vpop.xlane.xlu1 %238 }
 0x17b   :  { %v246_v14 = vmul.f32 0.03125, %v237_v12  ;;  %1076 = vrsqrt.f32 %v252_v10  ;;  %v247_v19 = vmul.f32 0.03125, %v239_v13 }
 0x17c   :  { %v1067_v15 = vpop.eup %1066  ;;  %1078 = vrsqrt.f32 %v253_v11 }
 0x17d   :  { %v264_v17 = vmul.f32 %v1067_v15, %v1406_v31  ;;  %v254_v20 = vadd.f32 1e-05, %v246_v14  ;;  %v255_v27 = vadd.f32 1e-05, %v247_v19 }
 0x17f   :  { %v272_v22 = vmul.f32 %v888_v16, %v264_v17  ;;  %1080 = vrsqrt.f32 %v254_v20 }
 0x180   :  { %v1069_v23 = vpop.eup %1068  ;;  %1082 = vrsqrt.f32 %v255_v27 }
 0x181   :  { %v1071_v25 = vpop.eup %1070  ;;  %v280_v26 = vadd.f32 %v889_v21, %v272_v22  ;;  %v266_v29 = vmul.f32 %v1069_v23, %v1409_v32 }
 0x182   :  { %v265_v28 = vmul.f32 %v1071_v25, %v1416_v41 }
 0x183   :  { %490 = vmatmul.mubr.f32.vlgmr.msra.gmra.mxu1 %v280_v26  ;;  %v274_v36 = vmul.f32 %v888_v16, %v266_v29 }
 0x184   :  { %v1073_v30 = vpop.eup %1072  ;;  %495 = vmatprep.mubr.f32.mxu1 %v1266_v9  ;;  %v273_v31 = vmul.f32 %v888_v16, %v265_v28 }
 0x185   :  { %v1075_v33 = vpop.eup %1074  ;;  %v153_v34 = vmul.f32 %v1073_v30, %v1428_v51  ;;  %v282_v32 = vadd.f32 %v889_v21, %v274_v36  ;;  %v640_v36 = vld [vmem:[#allocation10 + $0x78] sm:$0xff] }
 0x186   :  { %v281_v35 = vadd.f32 %v889_v21, %v273_v31  ;;  %v267_v37 = vmul.f32 %v1075_v33, %v1419_v42 }
 0x187   :  { %v160_v38 = vmul.f32 %v888_v16, %v153_v34 }
 0x188   :  { %496 = vmatmul.mubr.f32.gmra.mxu1 %v281_v35  ;;  %v1077_v39 = vpop.eup %1076  ;;  %v275_v40 = vmul.f32 %v888_v16, %v267_v37  ;;  %v639_v37 = vld [vmem:[#allocation10 + $0x70] sm:$0xff] }
 0x189   :  { %501 = vmatprep.mubr.f32.mxu1 %v1266_v9  ;;  %v167_v41 = vadd.f32 %v889_v21, %v160_v38  ;;  %v268_v43 = vmul.f32 %v1077_v39, %v1431_v52  ;;  %v1079_v44 = vpop.eup %1078  ;;  %v638_v38 = vld [vmem:[#allocation10 + $0x68] sm:$0xff]  ;;  %v637_v39 = vld [vmem:[#allocation10 + $0x60] sm:$0xff] }
 0x18a   :  { %v283_v51 = vadd.f32 %v889_v21, %v275_v40  ;;  %v269_v45 = vmul.f32 %v1079_v44, %v1440_v59  ;;  %v634_v40 = vld [vmem:[#allocation10 + $0x48] sm:$0xff]  ;;  %v632_v44 = vld [vmem:[#allocation10 + $0x38] sm:$0xff] }
 0x18b   :  { %981 = vmatmul.mubr.f32.vlgmr.msra.gmra.mxu0 %v167_v41  ;;  %v276_v42 = vmul.f32 %v888_v16, %v268_v43  ;;  %v636_v41 = vld [vmem:[#allocation10 + $0x58] sm:$0xff]  ;;  %v633_v43 = vld [vmem:[#allocation10 + $0x40] sm:$0xff] }
 0x18c   :  { %502 = vmatmul.mubr.f32.gmra.mxu1 %v282_v32  ;;  %1015 = vmatprep.mubr.msk.f32.mxu0 %vm1267_vm1, %v1266_v9  ;;  %v1081_v46 = vpop.eup %1080  ;;  %v277_v48 = vmul.f32 %v888_v16, %v269_v45  ;;  %v635_v32 = vld [vmem:[#allocation10 + $0x50] sm:$0xff]  ;;  %v629_v45 = vld [vmem:[#allocation10 + $0x20] sm:$0xff] }
 0x18d   :  { %507 = vmatprep.mubr.f32.mxu1 %v1266_v9  ;;  %v284_v47 = vadd.f32 %v889_v21, %v276_v42  ;;  %v270_v52 = vmul.f32 %v1081_v46, %v1443_v60  ;;  %v1083_v49 = vpop.eup %1082  ;;  %v1501_v60 = vshrl.u32 %v134_v18, 7  ;;  %984 = vmatpush3.msra.mxu0 %v640_v36  ;;  %v630_v42 = vld [vmem:[#allocation10 + $0x28] sm:$0xff]  ;;  %v628_v46 = vld [vmem:[#allocation10 + $0x18] sm:$0xff] }
 0x18e   :  { %v285_v50 = vadd.f32 %v889_v21, %v277_v48  ;;  %v271_v54 = vmul.f32 %v1083_v49, %v1451_v4  ;;  %v1507_v4 = vld [vmem:[%s1600_s11] sm:$0x3]  ;;  %985 = vmatprep.subr.mxu0 %v1266_v9  ;;  %v626_v48 = vld [vmem:[#allocation10 + $0x8] sm:$0xff] }
 0x18f   :  { %v278_v53 = vmul.f32 %v888_v16, %v270_v52  ;;  %v417_v58 = vsub.s32 0, %v1501_v60  ;;  %986 = vmatpush3.msra.mxu0 %v639_v37  ;;  %v625_v52 = vld [vmem:[#allocation10] sm:$0xff] }
 0x190   :  { %508 = vmatmul.mubr.f32.gmra.mxu1 %v283_v51  ;;  %v279_v55 = vmul.f32 %v888_v16, %v271_v54  ;;  %987 = vmatprep.subr.mxu0 %v1266_v9  ;;  %v631_v51 = vld [vmem:[#allocation10 + $0x30] sm:$0xff] }
 0x191   :  { %513 = vmatprep.mubr.f32.mxu1 %v1266_v9  ;;  %v286_v59 = vadd.f32 %v889_v21, %v278_v53  ;;  %v418_v62 = vrot.slane %v1507_v4, %v417_v58  ;;  %988 = vmatpush3.msra.mxu0 %v638_v38 }
 0x192   :  { %v287_v56 = vadd.f32 %v889_v21, %v279_v55  ;;  %989 = vmatprep.subr.mxu0 %v1266_v9 }
 0x193   :  { %990 = vmatpush3.msra.mxu0 %v637_v39 }
 0x194   :  { %514 = vmatmul.mubr.f32.gmra.mxu1 %v284_v47  ;;  %991 = vmatprep.subr.mxu0 %v1266_v9  ;;  %v627_v47 = vld [vmem:[#allocation10 + $0x10] sm:$0xff] }
 0x195   :  { %519 = vmatprep.mubr.f32.mxu1 %v1266_v9  ;;  %992 = vmatpush3.msra.mxu0 %v636_v41 }
 0x196   :  { %993 = vmatprep.subr.mxu0 %v1266_v9 }
 0x197   :  { %994 = vmatpush3.msra.mxu0 %v635_v32 }
 0x198   :  { %520 = vmatmul.mubr.f32.gmra.mxu1 %v285_v50  ;;  %995 = vmatprep.subr.mxu0 %v1266_v9 }
 0x199   :  { %525 = vmatprep.mubr.f32.mxu1 %v1266_v9  ;;  %996 = vmatpush3.msra.mxu0 %v634_v40 }
 0x19a   :  { %997 = vmatprep.subr.mxu0 %v1266_v9 }
 0x19b   :  { %998 = vmatpush3.msra.mxu0 %v633_v43 }
 0x19c   :  { %526 = vmatmul.mubr.f32.gmra.mxu1 %v286_v59  ;;  %999 = vmatprep.subr.mxu0 %v1266_v9 }
 0x19d   :  { %531 = vmatprep.mubr.f32.mxu1 %v1266_v9  ;;  %1000 = vmatpush3.msra.mxu0 %v632_v44 }
 0x19e   :  { %1001 = vmatprep.subr.mxu0 %v1266_v9 }
 0x19f   :  { %1002 = vmatpush3.msra.mxu0 %v631_v51  ;;  %v421_v51 = vsub.s32 1, %v1501_v60 }
 0x1a0   :  { %532 = vmatmul.mubr.f32.gmra.mxu1 %v287_v56  ;;  %1003 = vmatprep.subr.mxu0 %v1266_v9 }
 0x1a1   :  { %1050 = vmatprep.mubr.msk.f32.mxu1 %vm1267_vm1, %v1266_v9  ;;  %1004 = vmatpush3.msra.mxu0 %v630_v42  ;;  %v422_v42 = vrot.slane %v1507_v4, %v421_v51 }
 0x1a2   :  { %1005 = vmatprep.subr.mxu0 %v1266_v9 }
 0x1a3   :  { %1006 = vmatpush3.msra.mxu0 %v629_v45 }
 0x1a4   :  { %1007 = vmatprep.subr.mxu0 %v1266_v9 }
 0x1a5   :  { %1008 = vmatpush3.msra.mxu0 %v628_v46 }
 0x1a6   :  { %1009 = vmatprep.subr.mxu0 %v1266_v9 }
 0x1a7   :  { %1010 = vmatpush3.msra.mxu0 %v627_v47 }
 0x1a8   :  { %1011 = vmatprep.subr.mxu0 %v1266_v9 }
 0x1a9   :  { %1012 = vmatpush3.msra.mxu0 %v626_v48 }
 0x1aa   :  { %1013 = vmatprep.subr.mxu0 %v1266_v9 }
 0x1ab   :  { %1014 = vmatpush3.msra.mxu0 %v625_v52 }
 0x243   :  { %v491_v57 = vpop.f32.mrf.mxu1 }
 0x244   :  { %v492_v2 = vadd.f32 %v491_v57, %v418_v62 }
 0x245   :  { %v1509_v61 = vpop.f32.mrf.mxu1 }
 0x246   :  { %v494_v46 = vadd.f32 %v1509_v61, %v422_v42 }
 0x248   :  { %v497_v63 = vpop.f32.mrf.mxu1 }
 0x249   :  { %v498_v3 = vadd.f32 %v497_v63, %v418_v62 }
 0x24a   :  { %v1515_v1 = vpop.f32.mrf.mxu1 }
 0x24b   :  { %v377_v18 = vpop.f32.mrf.mxu0  ;;  %v500_v47 = vadd.f32 %v1515_v1, %v422_v42 }
 0x24c   :  { %v378_v5 = vadd.f32 %v890_v0, %v377_v18  ;;  %v503_v6 = vpop.f32.mrf.mxu1 }
 0x24d   :  { %v982_v7 = vpop.f32.mrf.mxu0  ;;  %v504_v8 = vadd.f32 %v503_v6, %v418_v62 }
 0x24e   :  { %v1517_v10 = vpop.f32.mrf.mxu1  ;;  %v541_v11 = vmul.f32 %v498_v3, %v378_v5  ;;  %v538_v12 = vmul.f32 %v492_v2, %v378_v5 }
 0x24f   :  { %v544_v16 = vmul.f32 %v504_v8, %v378_v5 }
 0x250   :  { %v509_v13 = vpop.f32.mrf.mxu1  ;;  %542 = vadd.xlane.f32.xlu1 %v541_v11  ;;  %539 = vadd.xlane.f32.xlu0 %v538_v12 }
 0x251   :  { %v510_v14 = vadd.f32 %v509_v13, %v418_v62 }
 0x252   :  { %v1519_v15 = vpop.f32.mrf.mxu1 }
 0x253   :  { %v547_v17 = vmul.f32 %v510_v14, %v378_v5 }
 0x254   :  { %v515_v19 = vpop.f32.mrf.mxu1  ;;  %545 = vadd.xlane.f32.xlu0 %v544_v16 }
 0x255   :  { %v516_v20 = vadd.f32 %v515_v19, %v418_v62  ;;  %548 = vadd.xlane.f32.xlu1 %v547_v17 }
 0x256   :  { %v1521_v21 = vpop.f32.mrf.mxu1 }
 0x257   :  { %v550_v22 = vmul.f32 %v516_v20, %v378_v5  ;;  %v518_v4 = vadd.f32 %v1521_v21, %v422_v42 }
 0x258   :  { %v521_v23 = vpop.f32.mrf.mxu1 }
 0x259   :  { %v522_v25 = vadd.f32 %v521_v23, %v418_v62  ;;  %551 = vadd.xlane.f32.xlu0 %v550_v22 }
 0x25a   :  { %v1523_v26 = vpop.f32.mrf.mxu1 }
 0x25b   :  { %v553_v27 = vmul.f32 %v522_v25, %v378_v5  ;;  %v524_v1 = vadd.f32 %v1523_v26, %v422_v42  ;;  %v891_v26 = vld [vmem:[%s1602_s13] ss:$0 sm:$0xff] }
 0x25c   :  { %v527_v28 = vpop.f32.mrf.mxu1 }
 0x25d   :  { %v528_v29 = vadd.f32 %v527_v28, %v418_v62  ;;  %554 = vadd.xlane.f32.xlu1 %v553_v27 }
 0x25e   :  { %v1525_v30 = vpop.f32.mrf.mxu1 }
 0x25f   :  { %v556_v31 = vmul.f32 %v528_v29, %v378_v5 }
 0x260   :  { %v533_v33 = vpop.f32.mrf.mxu1 }
 0x261   :  { %v534_v34 = vadd.f32 %v533_v33, %v418_v62  ;;  %557 = vadd.xlane.f32.xlu0 %v556_v31 }
 0x263   :  { %v559_v35 = vmul.f32 %v534_v34, %v378_v5 }
 0x265   :  { %560 = vadd.xlane.f32.xlu1 %v559_v35 }
 0x2d9   :  { %v540_v49 = vpop.xlane.xlu0 %539  ;;  %v543_v50 = vpop.xlane.xlu1 %542 }
 0x2da   :  { %v562_v54 = vmax.f32 %v540_v49, %v543_v50 }
 0x2dd   :  { %v546_v53 = vpop.xlane.xlu0 %545 }
 0x2de   :  { %v563_v59 = vmax.f32 %v562_v54, %v546_v53  ;;  %v549_v55 = vpop.xlane.xlu1 %548 }
 0x2e0   :  { %v564_v56 = vmax.f32 %v563_v59, %v549_v55 }
 0x2e2   :  { %v552_v57 = vpop.xlane.xlu0 %551 }
 0x2e3   :  { %v565_v62 = vmax.f32 %v564_v56, %v552_v57 }
 0x2e6   :  { %v555_v58 = vpop.xlane.xlu1 %554 }
 0x2e7   :  { %v566_v0 = vmax.f32 %v565_v62, %v555_v58 }
 0x2ea   :  { %v558_v63 = vpop.xlane.xlu0 %557 }
 0x2eb   :  { %v567_v18 = vmax.f32 %v566_v0, %v558_v63 }
 0x2ee   :  { %v561_v2 = vpop.xlane.xlu1 %560 }
 0x2ef   :  { %v568_v3 = vmax.f32 %v567_v18, %v561_v2 }
 0x2f1   :  { %v569_v5 = vsub.f32 %v540_v49, %v568_v3  ;;  %v572_v6 = vsub.f32 %v543_v50, %v568_v3  ;;  %v575_v7 = vsub.f32 %v546_v53, %v568_v3  ;;  %v578_v8 = vsub.f32 %v549_v55, %v568_v3 }
 0x2f2   :  { %v581_v14 = vsub.f32 %v552_v57, %v568_v3  ;;  %v584_v17 = vsub.f32 %v555_v58, %v568_v3  ;;  %v587_v20 = vsub.f32 %v558_v63, %v568_v3  ;;  %v590_v23 = vsub.f32 %v561_v2, %v568_v3  ;;  %v535_v2 = vpop.f32.mrf.mxu1 }
 0x2f3   :  { %v570_v11 = vmul.f32 1.442695, %v569_v5  ;;  %v573_v12 = vmul.f32 1.442695, %v572_v6  ;;  %v576_v13 = vmul.f32 1.442695, %v575_v7  ;;  %v506_v50 = vadd.f32 %v1517_v10, %v422_v42 }
 0x2f4   :  { %v579_v16 = vmul.f32 1.442695, %v578_v8  ;;  %v582_v19 = vmul.f32 1.442695, %v581_v14  ;;  %v585_v22 = vmul.f32 1.442695, %v584_v17  ;;  %v512_v55 = vadd.f32 %v1519_v15, %v422_v42 }
 0x2f5   :  { %1084 = vpow2.f32 %v570_v11  ;;  %v588_v25 = vmul.f32 1.442695, %v587_v20  ;;  %v591_v27 = vmul.f32 1.442695, %v590_v23  ;;  %v530_v10 = vadd.f32 %v1525_v30, %v422_v42  ;;  %v761_v17 = vld [vmem:[#allocation11 + $0x78] sm:$0xff]  ;;  %v760_v30 = vld [vmem:[#allocation11 + $0x70] sm:$0xff] }
 0x2f6   :  { %1086 = vpow2.f32 %v573_v12  ;;  %v536_v15 = vadd.f32 %v535_v2, %v422_v42  ;;  %1019 = vmatpush3.msra.mxu1 %v761_v17  ;;  %v758_v20 = vld [vmem:[#allocation11 + $0x60] sm:$0xff] }
 0x2f7   :  { %1088 = vpow2.f32 %v576_v13  ;;  %1020 = vmatprep.subr.mxu1 %v1266_v9 }
 0x2f8   :  { %1090 = vpow2.f32 %v579_v16  ;;  %1021 = vmatpush3.msra.mxu1 %v760_v30 }
 0x2f9   :  { %1092 = vpow2.f32 %v582_v19  ;;  %v759_v19 = vld [vmem:[#allocation11 + $0x68] sm:$0xff]  ;;  %1022 = vmatprep.subr.mxu1 %v1266_v9 }
 0x2fa   :  { %1094 = vpow2.f32 %v585_v22  ;;  %1023 = vmatpush3.msra.mxu1 %v759_v19 }
 0x2fb   :  { %1096 = vpow2.f32 %v588_v25  ;;  %1024 = vmatprep.subr.mxu1 %v1266_v9 }
 0x2fc   :  { %1098 = vpow2.f32 %v591_v27  ;;  %1025 = vmatpush3.msra.mxu1 %v758_v20 }
 0x2fd   :  { %1026 = vmatprep.subr.mxu1 %v1266_v9 }
 0x302   :  { %v1085_v28 = vpop.eup %1084 }
 0x303   :  { %v1087_v29 = vpop.eup %1086 }
 0x304   :  { %v593_v31 = vadd.f32 %v1087_v29, %v1085_v28  ;;  %v1089_v33 = vpop.eup %1088 }
 0x305   :  { %v1091_v35 = vpop.eup %1090 }
 0x306   :  { %v594_v34 = vadd.f32 %v1089_v33, %v593_v31  ;;  %v1093_v37 = vpop.eup %1092  ;;  %v756_v31 = vld [vmem:[#allocation11 + $0x50] sm:$0xff] }
 0x307   :  { %v1095_v39 = vpop.eup %1094 }
 0x308   :  { %v595_v36 = vadd.f32 %v1091_v35, %v594_v34  ;;  %v1097_v32 = vpop.eup %1096  ;;  %v754_v34 = vld [vmem:[#allocation11 + $0x40] sm:$0xff] }
 0x309   :  { %v1099_v43 = vpop.eup %1098 }
 0x30a   :  { %v596_v38 = vadd.f32 %v1093_v37, %v595_v36  ;;  %v752_v36 = vld [vmem:[#allocation11 + $0x30] sm:$0xff] }
 0x30c   :  { %v597_v41 = vadd.f32 %v1095_v39, %v596_v38  ;;  %v750_v38 = vld [vmem:[#allocation11 + $0x20] sm:$0xff] }
 0x30e   :  { %v598_v40 = vadd.f32 %v1097_v32, %v597_v41  ;;  %v748_v41 = vld [vmem:[#allocation11 + $0x10] sm:$0xff] }
 0x310   :  { %v599_v44 = vadd.f32 %v1099_v43, %v598_v40  ;;  %v746_v40 = vld [vmem:[#allocation11] sm:$0xff] }
 0x312   :  { %1100 = vrcp.f32 %v599_v44 }
 0x31f   :  { %v1101_v45 = vpop.eup %1100 }
 0x320   :  { %v602_v48 = vmul.f32 %v1101_v45, %v1085_v28  ;;  %v604_v52 = vmul.f32 %v1101_v45, %v1087_v29  ;;  %v607_v49 = vmul.f32 %v1101_v45, %v1089_v33  ;;  %v610_v59 = vmul.f32 %v1101_v45, %v1091_v35  ;;  %v757_v29 = vld [vmem:[#allocation11 + $0x58] sm:$0xff]  ;;  %v755_v33 = vld [vmem:[#allocation11 + $0x48] sm:$0xff] }
 0x321   :  { %v613_v60 = vmul.f32 %v1101_v45, %v1093_v37  ;;  %v616_v61 = vmul.f32 %v1101_v45, %v1095_v39  ;;  %v619_v18 = vmul.f32 %v1101_v45, %v1097_v32  ;;  %v622_v6 = vmul.f32 %v1101_v45, %v1099_v43  ;;  %1027 = vmatpush3.msra.mxu1 %v757_v29  ;;  %v753_v35 = vld [vmem:[#allocation11 + $0x38] sm:$0xff]  ;;  %v751_v37 = vld [vmem:[#allocation11 + $0x28] sm:$0xff] }
 0x322   :  { %v603_v53 = vmul.f32 %v602_v48, %v494_v46  ;;  %v605_v54 = vmul.f32 %v604_v52, %v500_v47  ;;  %v608_v57 = vmul.f32 %v607_v49, %v506_v50  ;;  %v611_v62 = vmul.f32 %v610_v59, %v512_v55  ;;  %1028 = vmatprep.subr.mxu1 %v1266_v9  ;;  %v749_v39 = vld [vmem:[#allocation11 + $0x18] sm:$0xff]  ;;  %v747_v32 = vld [vmem:[#allocation11 + $0x8] sm:$0xff] }
 0x323   :  { %v614_v0 = vmul.f32 %v613_v60, %v518_v4  ;;  %v617_v5 = vmul.f32 %v616_v61, %v524_v1  ;;  %v620_v8 = vmul.f32 %v619_v18, %v530_v10  ;;  %v623_v12 = vmul.f32 %v622_v6, %v536_v15  ;;  %1029 = vmatpush3.msra.mxu1 %v756_v31  ;;  %v892_v45 = vld [vmem:[%s1593_s4] ss:$0 sm:$0xff] }
 0x324   :  { %v606_v56 = vadd.f32 %v605_v54, %v603_v53  ;;  %1030 = vmatprep.subr.mxu1 %v1266_v9  ;;  %v893_v47 = vld [vmem:[%s1594_s5] ss:$0 sm:$0xff] }
 0x325   :  { %1031 = vmatpush3.msra.mxu1 %v755_v33  ;;  %v895_v1 = vld [vmem:[%s1595_s6] ss:$0 sm:$0xff] }
 0x326   :  { %v609_v58 = vadd.f32 %v608_v57, %v606_v56  ;;  %1032 = vmatprep.subr.mxu1 %v1266_v9 }
 0x327   :  { %1033 = vmatpush3.msra.mxu1 %v754_v34 }
 0x328   :  { %v612_v63 = vadd.f32 %v611_v62, %v609_v58  ;;  %1034 = vmatprep.subr.mxu1 %v1266_v9 }
 0x329   :  { %1035 = vmatpush3.msra.mxu1 %v753_v35 }
 0x32a   :  { %v615_v3 = vadd.f32 %v614_v0, %v612_v63  ;;  %1036 = vmatprep.subr.mxu1 %v1266_v9  ;;  %v896_v0 = vld [vmem:[%s1596_s7] ss:$0 sm:$0xff] }
 0x32b   :  { %1037 = vmatpush3.msra.mxu1 %v752_v36 }
 0x32c   :  { %v618_v7 = vadd.f32 %v617_v5, %v615_v3  ;;  %1038 = vmatprep.subr.mxu1 %v1266_v9 }
 0x32d   :  { %1039 = vmatpush3.msra.mxu1 %v751_v37 }
 0x32e   :  { %v621_v11 = vadd.f32 %v620_v8, %v618_v7  ;;  %1040 = vmatprep.subr.mxu1 %v1266_v9 }
 0x32f   :  { %1041 = vmatpush3.msra.mxu1 %v750_v38 }
 0x330   :  { %v624_v21 = vadd.f32 %v623_v12, %v621_v11  ;;  %1042 = vmatprep.subr.mxu1 %v1266_v9 }
 0x331   :  { %1043 = vmatpush3.msra.mxu1 %v749_v39 }
 0x332   :  { %1016 = vmatmul.mubr.f32.vlgmr.msra.gmra.mxu0 %v624_v21  ;;  %1044 = vmatprep.subr.mxu1 %v1266_v9 }
 0x333   :  { %1045 = vmatpush3.msra.mxu1 %v748_v41 }
 0x334   :  { %1046 = vmatprep.subr.mxu1 %v1266_v9 }
 0x335   :  { %1047 = vmatpush3.msra.mxu1 %v747_v32 }
 0x336   :  { %1048 = vmatprep.subr.mxu1 %v1266_v9  ;;  %v894_v9 = vld [vmem:[%s1604_s15] ss:$0 sm:$0xff] }
 0x337   :  { %1049 = vmatpush3.msra.mxu1 %v746_v40 }
 0x3f2   :  { %v714_v13 = vpop.f32.mrf.mxu0 }
 0x3f3   :  { %v715_v14 = vadd.f32 %v891_v26, %v714_v13 }
 0x3f4   :  { %v1017_v16 = vpop.f32.mrf.mxu0 }
 0x3f5   :  { %720 = vadd.xlane.f32.xlu0 %v715_v14 }
 0x47e   :  { %v721_v22 = vpop.xlane.xlu0 %720 }
 0x47f   :  { %v722_v23 = vmul.f32 0.03125, %v721_v22 }
 0x481   :  { %v723_v25 = vsub.f32 %v715_v14, %v722_v23 }
 0x483   :  { %v724_v27 = vmul.f32 %v1403_v24, %v723_v25 }
 0x485   :  { %v725_v28 = vmul.f32 %v724_v27, %v724_v27 }
 0x487   :  { %726 = vadd.xlane.f32.xlu1 %v725_v28 }
 0x510   :  { %v727_v43 = vpop.xlane.xlu1 %726 }
 0x511   :  { %v728_v44 = vmul.f32 0.03125, %v727_v43 }
 0x513   :  { %v729_v51 = vadd.f32 1e-05, %v728_v44 }
 0x515   :  { %1102 = vrsqrt.f32 %v729_v51 }
 0x522   :  { %v1103_v42 = vpop.eup %1102 }
 0x523   :  { %v731_v46 = vmul.f32 %v1103_v42, %v724_v27 }
 0x525   :  { %v738_v48 = vmul.f32 %v892_v45, %v731_v46 }
 0x527   :  { %v745_v52 = vadd.f32 %v893_v47, %v738_v48 }
 0x529   :  { %1051 = vmatmul.mubr.f32.vlgmr.msra.gmra.mxu1 %v745_v52 }
 0x5e9   :  { %v835_v49 = vpop.f32.mrf.mxu1 }
 0x5ea   :  { %v836_v50 = vadd.f32 %v894_v9, %v835_v49 }
 0x5eb   :  { %v1052_v53 = vpop.f32.mrf.mxu1 }
 0x5ec   :  { %v839_v54 = vadd.f32 %v836_v50, %v745_v52 }
 0x5ee   :  { %842 = vadd.xlane.f32.xlu0 %v839_v54 }
 0x677   :  { %v843_v59 = vpop.xlane.xlu0 %842 }
 0x678   :  { %v844_v55 = vmul.f32 0.03125, %v843_v59 }
 0x67a   :  { %v845_v56 = vsub.f32 %v839_v54, %v844_v55 }
 0x67c   :  { %v846_v57 = vmul.f32 %v1403_v24, %v845_v56 }
 0x67e   :  { %v847_v60 = vmul.f32 %v846_v57, %v846_v57 }
 0x680   :  { %848 = vadd.xlane.f32.xlu1 %v847_v60 }
 0x709   :  { %v849_v4 = vpop.xlane.xlu1 %848 }
 0x70a   :  { %v850_v58 = vmul.f32 0.03125, %v849_v4 }
 0x70c   :  { %v851_v62 = vadd.f32 1e-05, %v850_v58 }
 0x70e   :  { %1104 = vrsqrt.f32 %v851_v62 }
 0x71b   :  { %v1105_v61 = vpop.eup %1104 }
 0x71c   :  { %v853_v63 = vmul.f32 %v1105_v61, %v846_v57 }
 0x71e   :  { %v860_v18 = vmul.f32 %v895_v1, %v853_v63 }
 0x720   :  { %v867_v24 = vadd.f32 %v896_v0, %v860_v18 }
 0x722   :  { %868 = vst [vmem:[#allocation13] sm:$0xff] %v867_v24 }
 0x723   :  { %1237 = shalt.err (!%p1234_p6)
}
 0x724   :  { %878 = dma.vmem_to_hbm [thread:$0]  %s876_s19, 128, %s1605_s16, [#allocation4]  }
 0x725   :  { %1254 = dma.done.wait [#allocation4], 128  }
 0x726   :  { %1255 = vsyncadd [#allocation4], 4294967168 }
 0x727   :  { %882 = vsyncpa [#allocation3], 1 }
 0x728   :  { %883 = vsyncpa [#allocation6], 1 }
 0x729   :  { %884 = vsyncpa [#allocation9], 1 }
 0x72a   :  { %885 = vsyncpa [#allocation12], 1 }
 0x72b   :  { %886 = vsyncpa [#allocation4], 1 }

</bundles_post_ra>
